<compile_context>
chip_gen: v5e
topology: v5e:2x2
jax: 0.10.0
libtpu: 0.0.40
codegen_flags: <defaults>
</compile_context>

<pallas_src>
import functools
import math

import jax
import jax.numpy as jnp
from jax import lax
from jax.experimental import pallas as pl
from jax.experimental.pallas import tpu as pltpu


_STATIC_UNROLL_MAX_T = 16  # fully unroll the recurrence only for small T


def _round_up(x, m):
    return ((x + m - 1) // m) * m


# ----------------------------------------------------------------------------
# Fused Pallas kernel: all LSTM layers + FC + sigmoid
# ----------------------------------------------------------------------------

def _lstm_gate_math(gates, c, H):
    """One LSTM cell update. Gate columns are pre-permuted to [i, f, o, g]."""
    sig = jax.nn.sigmoid(gates[:, : 3 * H])          # single EUP pass: i, f, o
    g_g = jnp.tanh(gates[:, 3 * H:])                 # tanh only on the g block
    i_g = sig[:, 0 * H:1 * H]
    f_g = sig[:, 1 * H:2 * H]
    o_g = sig[:, 2 * H:3 * H]
    c_new = f_g * c + i_g * g_g
    h_new = o_g * jnp.tanh(c_new)
    return h_new, c_new


def _fused_lstm_fc_kernel(n_layers, *refs):
    """refs = (x, [w_ih_t, w_hh_t, bias] * n_layers, w_fc_t, b_fc,
               out, h_n, c_n, seq_scratch, xw_scratch)."""
    x_ref = refs[0]
    layer_refs = refs[1:1 + 3 * n_layers]
    wfc_ref = refs[1 + 3 * n_layers]
    bfc_ref = refs[2 + 3 * n_layers]
    out_ref, hn_ref, cn_ref, seq_scr, xw_scr = refs[3 + 3 * n_layers:]

    T, B, _ = x_ref.shape
    H = hn_ref.shape[-1]

    h = None
    for layer in range(n_layers):
        wih_t = layer_refs[3 * layer + 0][...]        # (in, 4H) bf16
        whh_t = layer_refs[3 * layer + 1][...]        # (H, 4H)  bf16
        bias = layer_refs[3 * layer + 2][...]         # (1, 4H)  f32 = b_ih+b_hh
        last_layer = layer == n_layers - 1

        # Hoisted input projection over the whole sequence: one big bf16 MXU
        # matmul, f32 accumulation, bias folded in once.  Stored to a VMEM
        # slab so per-step access is leading-dim ref indexing and the value
        # does not stay live across the recurrence.
        src = x_ref[...] if layer == 0 else seq_scr[...]     # bf16
        in_dim = src.shape[-1]
        xw = jnp.dot(src.reshape(T * B, in_dim), wih_t,
                     preferred_element_type=jnp.float32) + bias
        xw_scr[...] = xw.reshape(T, B, 4 * H)

        h = jnp.zeros((B, H), jnp.float32)
        c = jnp.zeros((B, H), jnp.float32)

        if T <= _STATIC_UNROLL_MAX_T:
            # Small T: static unroll, h/c carried in vregs.
            for t in range(T):
                gates = xw_scr[t] + jnp.dot(h.astype(whh_t.dtype), whh_t,
                                            preferred_element_type=jnp.float32)
                h, c = _lstm_gate_math(gates, c, H)
                if not last_layer:
                    seq_scr[t] = h.astype(seq_scr.dtype)
        else:
            # Large T: bounded live ranges via fori_loop with modest unroll.
            def body(t, carry, _whh=whh_t, _last=last_layer):
                h_c, c_c = carry
                gates = xw_scr[t] + jnp.dot(h_c.astype(_whh.dtype), _whh,
                                            preferred_element_type=jnp.float32)
                h_n, c_n = _lstm_gate_math(gates, c_c, H)
                if not _last:
                    seq_scr[t] = h_n.astype(seq_scr.dtype)
                return (h_n, c_n)

            h, c = lax.fori_loop(0, T, body, (h, c), unroll=4)

        hn_ref[layer] = h
        cn_ref[layer] = c

    # dropout(p=0.4): eval-mode identity.
    # FC + sigmoid epilogue on the last hidden state (still vreg-resident).
    z = jnp.dot(h.astype(wfc_ref.dtype), wfc_ref[...],
                preferred_element_type=jnp.float32) + bfc_ref[...]
    out_ref[...] = jax.nn.sigmoid(z)


# ----------------------------------------------------------------------------
# Wrapper
# ----------------------------------------------------------------------------

def _full_spec(shape):
    zeros = (0,) * len(shape)
    return pl.BlockSpec(shape, lambda i, z=zeros: z)


def lstm_forward(input_seq, hidden, params):
    """Mirror of LSTM.forward(input_seq, hidden).

    input_seq: (B, T, input_size), batch_first like PyTorch.
    hidden: (h0, c0) -- ignored, exactly as the PyTorch module does.
    Returns (out, (h_n, c_n)) with out: (B, output_size).
    """
    del hidden  # forward() re-initializes hidden to zeros via init_hidden()

    layers = params["lstm_layers"]
    n_layers = len(layers)
    H = layers[0]["w_hh_t"].shape[0]
    O = params["w_fc_t"].shape[1]
    in_pad = layers[0]["w_ih_t"].shape[0]        # padded layer-0 feature dim

    # One tiny relayout to time-major + zero-pad features to the padded K dim
    # + cast to the bf16 MXU operand dtype.  All done once, outside the kernel.
    x = jnp.transpose(input_seq.astype(jnp.float32), (1, 0, 2))   # (T, B, I)
    T, B, I = x.shape
    if I < in_pad:
        x = jnp.pad(x, ((0, 0), (0, 0), (0, in_pad - I)))
    x = x.astype(jnp.bfloat16)

    flat_inputs = [x]
    for lp in layers:
        flat_inputs += [lp["w_ih_t"], lp["w_hh_t"], lp["bias"]]
    flat_inputs += [params["w_fc_t"], params["b_fc"]]

    out_shape = (
        jax.ShapeDtypeStruct((B, O), jnp.float32),            # out
        jax.ShapeDtypeStruct((n_layers, B, H), jnp.float32),  # h_n
        jax.ShapeDtypeStruct((n_layers, B, H), jnp.float32),  # c_n
    )

    out, h_n, c_n = pl.pallas_call(
        functools.partial(_fused_lstm_fc_kernel, n_layers),
        out_shape=out_shape,
        grid=(1,),
        in_specs=[_full_spec(a.shape) for a in flat_inputs],
        out_specs=tuple(_full_spec(s.shape) for s in out_shape),
        scratch_shapes=[
            pltpu.VMEM((T, B, H), jnp.bfloat16),        # inter-layer hidden seq
            pltpu.VMEM((T, B, 4 * H), jnp.float32),     # hoisted xW_ih^T + b
        ],
        compiler_params=pltpu.CompilerParams(
            dimension_semantics=("arbitrary",)),
    )(*flat_inputs)
    return out, (h_n, c_n)


# ----------------------------------------------------------------------------
# Deterministic parameter construction (PyTorch-style uniform init).
# Kernel weights: gate-permuted [i,f,o,g], transposed, bf16; an f32 PyTorch-
# layout copy is kept under "ref" for the pure-JAX reference check.
# ----------------------------------------------------------------------------

def make_params(key, input_size, hidden_size, output_size, n_layers):
    H = hidden_size
    bound = 1.0 / math.sqrt(H)

    def permute_gates(w):   # PyTorch rows [i,f,g,o] -> kernel order [i,f,o,g]
        return jnp.concatenate(
            [w[0:H], w[H:2 * H], w[3 * H:4 * H], w[2 * H:3 * H]], axis=0)

    kernel_layers, ref_layers = [], []
    for layer in range(n_layers):
        in_sz = input_size if layer == 0 else hidden_size
        in_pad = _round_up(in_sz, 32) if layer == 0 else in_sz
        key, k1, k2, k3, k4 = jax.random.split(key, 5)
        w_ih = jax.random.uniform(k1, (4 * H, in_sz), jnp.float32, -bound, bound)
        w_hh = jax.random.uniform(k2, (4 * H, H), jnp.float32, -bound, bound)
        b_ih = jax.random.uniform(k3, (4 * H,), jnp.float32, -bound, bound)
        b_hh = jax.random.uniform(k4, (4 * H,), jnp.float32, -bound, bound)

        w_ih_p = permute_gates(w_ih)
        if in_pad > in_sz:
            w_ih_p = jnp.pad(w_ih_p, ((0, 0), (0, in_pad - in_sz)))
        kernel_layers.append({
            "w_ih_t": w_ih_p.T.astype(jnp.bfloat16),             # (in_pad, 4H)
            "w_hh_t": permute_gates(w_hh).T.astype(jnp.bfloat16),  # (H, 4H)
            "bias": permute_gates(b_ih + b_hh)[None, :],            # (1, 4H) f32
        })
        ref_layers.append({"w_ih": w_ih, "w_hh": w_hh, "b_ih": b_ih, "b_hh": b_hh})

    key, k5, k6 = jax.random.split(key, 3)
    fc_bound = 1.0 / math.sqrt(H)
    w_fc = jax.random.uniform(k5, (output_size, H), jnp.float32, -fc_bound, fc_bound)
    b_fc = jax.random.uniform(k6, (output_size,), jnp.float32, -fc_bound, fc_bound)

    return {
        "lstm_layers": kernel_layers,
        "w_fc_t": w_fc.T.astype(jnp.bfloat16),
        "b_fc": b_fc[None, :],
        "ref": {"layers": ref_layers, "w_fc": w_fc, "b_fc": b_fc},
    }


# ----------------------------------------------------------------------------
# Pure-JAX f32 reference (PyTorch semantics) for validation
# ----------------------------------------------------------------------------

def lstm_reference(x, ref_params):
    B, T, _ = x.shape
    layers = ref_params["layers"]
    H = layers[0]["w_hh"].shape[1]
    seq = x.astype(jnp.float32)
    h_last, c_last = [], []
    for lp in layers:
        h = jnp.zeros((B, H), jnp.float32)
        c = jnp.zeros((B, H), jnp.float32)
        outs = []
        for t in range(T):
            g = (seq[:, t] @ lp["w_ih"].T + lp["b_ih"]
                 + h @ lp["w_hh"].T + lp["b_hh"])
            i = jax.nn.sigmoid(g[:, 0 * H:1 * H])
            f = jax.nn.sigmoid(g[:, 1 * H:2 * H])
            gg = jnp.tanh(g[:, 2 * H:3 * H])
            o = jax.nn.sigmoid(g[:, 3 * H:4 * H])
            c = f * c + i * gg
            h = o * jnp.tanh(c)
            outs.append(h)
        seq = jnp.stack(outs, axis=1)
        h_last.append(h)
        c_last.append(c)
    out = jax.nn.sigmoid(seq[:, -1] @ ref_params["w_fc"].T + ref_params["b_fc"])
    return out, (jnp.stack(h_last), jnp.stack(c_last))


# ----------------------------------------------------------------------------

if __name__ == "__main__":
    # Small shapes consistent with the module: input_size=24, output_size=1.
    B, T = 8, 8
    INPUT_SIZE, HIDDEN_SIZE, OUTPUT_SIZE, N_LAYERS = 24, 32, 1, 2

    key = jax.random.PRNGKey(0)
    key, kx = jax.random.split(key)
    x = jax.random.normal(kx, (B, T, INPUT_SIZE), dtype=jnp.float32)

    params = make_params(key, INPUT_SIZE, HIDDEN_SIZE, OUTPUT_SIZE, N_LAYERS)

    # "hidden" argument is ignored by forward(), as in the PyTorch module.
    hidden_in = (jnp.zeros((N_LAYERS, B, HIDDEN_SIZE), jnp.float32),
                 jnp.zeros((N_LAYERS, B, HIDDEN_SIZE), jnp.float32))

    fwd = jax.jit(lstm_forward)
    out, (h_n, c_n) = fwd(x, hidden_in, params)
    jax.block_until_ready((out, h_n, c_n))

    assert out.shape == (B, OUTPUT_SIZE)
    assert h_n.shape == (N_LAYERS, B, HIDDEN_SIZE)
    assert c_n.shape == (N_LAYERS, B, HIDDEN_SIZE)
    assert bool(jnp.all(jnp.isfinite(out)))
    assert bool(jnp.all(jnp.isfinite(h_n)))
    assert bool(jnp.all(jnp.isfinite(c_n)))

    # Validate against the f32 PyTorch-semantics reference (bf16 MXU operands
    # introduce small drift; gate math / accumulation stay f32).
    out_ref, (h_ref, _) = lstm_reference(x, params["ref"])
    assert bool(jnp.max(jnp.abs(out - out_ref)) < 2e-2)
    assert bool(jnp.max(jnp.abs(h_n - h_ref)) < 5e-2)

    print("KERNEL_OK")
</pallas_src>

<mosaic_0001>
module attributes {stable_mosaic.version = 11 : i64} {
  func.func @_fused_lstm_fc_kernel(%arg0: i32, %arg1: memref<8x8x32xbf16, #tpu.memory_space<vmem>>, %arg2: memref<32x128xbf16, #tpu.memory_space<vmem>>, %arg3: memref<32x128xbf16, #tpu.memory_space<vmem>>, %arg4: memref<1x128xf32, #tpu.memory_space<vmem>>, %arg5: memref<32x128xbf16, #tpu.memory_space<vmem>>, %arg6: memref<32x128xbf16, #tpu.memory_space<vmem>>, %arg7: memref<1x128xf32, #tpu.memory_space<vmem>>, %arg8: memref<32x1xbf16, #tpu.memory_space<vmem>>, %arg9: memref<1x1xf32, #tpu.memory_space<vmem>>, %arg10: memref<8x1xf32, #tpu.memory_space<vmem>>, %arg11: memref<2x8x32xf32, #tpu.memory_space<vmem>>, %arg12: memref<2x8x32xf32, #tpu.memory_space<vmem>>, %arg13: memref<8x8x32xbf16, #tpu.memory_space<vmem>>, %arg14: memref<8x8x128xf32, #tpu.memory_space<vmem>>) attributes {dimension_semantics = [#tpu.dimension_semantics<arbitrary>], iteration_bounds = array<i64: 1>, scalar_prefetch = 0 : i64, scratch_operands = 2 : i64, tpu.core_type = #tpu.core_type<tc>, window_params = [{pipeline_mode = #tpu.pipeline_mode<synchronous>, transform_indices = @transform_0, window_bounds = array<i64: 8, 8, 32>}, {pipeline_mode = #tpu.pipeline_mode<synchronous>, transform_indices = @transform_1, window_bounds = array<i64: 32, 128>}, {pipeline_mode = #tpu.pipeline_mode<synchronous>, transform_indices = @transform_2, window_bounds = array<i64: 32, 128>}, {pipeline_mode = #tpu.pipeline_mode<synchronous>, transform_indices = @transform_3, window_bounds = array<i64: 1, 128>}, {pipeline_mode = #tpu.pipeline_mode<synchronous>, transform_indices = @transform_4, window_bounds = array<i64: 32, 128>}, {pipeline_mode = #tpu.pipeline_mode<synchronous>, transform_indices = @transform_5, window_bounds = array<i64: 32, 128>}, {pipeline_mode = #tpu.pipeline_mode<synchronous>, transform_indices = @transform_6, window_bounds = array<i64: 1, 128>}, {pipeline_mode = #tpu.pipeline_mode<synchronous>, transform_indices = @transform_7, window_bounds = array<i64: 32, 1>}, {pipeline_mode = #tpu.pipeline_mode<synchronous>, transform_indices = @transform_8, window_bounds = array<i64: 1, 1>}, {pipeline_mode = #tpu.pipeline_mode<synchronous>, transform_indices = @transform_9, window_bounds = array<i64: 8, 1>}, {pipeline_mode = #tpu.pipeline_mode<synchronous>, transform_indices = @transform_10, window_bounds = array<i64: 2, 8, 32>}, {pipeline_mode = #tpu.pipeline_mode<synchronous>, transform_indices = @transform_11, window_bounds = array<i64: 2, 8, 32>}]} {
    %c0 = arith.constant 0 : index
    %c0_0 = arith.constant 0 : index
    %0 = vector.load %arg2[%c0, %c0_0] : memref<32x128xbf16, #tpu.memory_space<vmem>>, vector<32x128xbf16>
    %c0_1 = arith.constant 0 : index
    %c0_2 = arith.constant 0 : index
    %1 = vector.load %arg3[%c0_1, %c0_2] : memref<32x128xbf16, #tpu.memory_space<vmem>>, vector<32x128xbf16>
    %c0_3 = arith.constant 0 : index
    %c0_4 = arith.constant 0 : index
    %2 = vector.load %arg4[%c0_3, %c0_4] : memref<1x128xf32, #tpu.memory_space<vmem>>, vector<1x128xf32>
    %c0_5 = arith.constant 0 : index
    %c0_6 = arith.constant 0 : index
    %c0_7 = arith.constant 0 : index
    %3 = vector.load %arg1[%c0_5, %c0_6, %c0_7] : memref<8x8x32xbf16, #tpu.memory_space<vmem>>, vector<8x8x32xbf16>
    %4 = vector.shape_cast %3 : vector<8x8x32xbf16> to vector<64x32xbf16>
    %cst = arith.constant dense<0.000000e+00> : vector<64x128xf32>
    %5 = tpu.matmul %4, %0, %cst {dimension_numbers = #tpu.dot_dimension_numbers<[1], [0], [0], [1], [0, 0, 1, 1], [], []>} : vector<64x32xbf16>, vector<32x128xbf16>, vector<64x128xf32> -> vector<64x128xf32>
    %6 = vector.broadcast %2 : vector<1x128xf32> to vector<64x128xf32>
    %7 = arith.addf %5, %6 : vector<64x128xf32>
    %8 = vector.shape_cast %7 : vector<64x128xf32> to vector<8x8x128xf32>
    %c0_8 = arith.constant 0 : index
    %c0_9 = arith.constant 0 : index
    %c0_10 = arith.constant 0 : index
    %9 = vector.load %arg14[%c0_8, %c0_9, %c0_10] : memref<8x8x128xf32, #tpu.memory_space<vmem>>, vector<8x8x128xf32>
    tpu.vector_store %arg14[%c0_8, %c0_9, %c0_10], %8 {strides = array<i32>} : memref<8x8x128xf32, #tpu.memory_space<vmem>>, vector<8x8x128xf32>,
    %cst_11 = arith.constant 0.000000e+00 : f32
    %10 = vector.broadcast %cst_11 : f32 to vector<8x32xf32>
    %cst_12 = arith.constant 0.000000e+00 : f32
    %11 = vector.broadcast %cst_12 : f32 to vector<8x32xf32>
    %c0_13 = arith.constant 0 : index
    %c0_14 = arith.constant 0 : index
    %c0_15 = arith.constant 0 : index
    %12 = vector.load %arg14[%c0_13, %c0_14, %c0_15] : memref<8x8x128xf32, #tpu.memory_space<vmem>>, vector<1x8x128xf32>
    %13 = vector.shape_cast %12 : vector<1x8x128xf32> to vector<8x128xf32>
    %14 = arith.truncf %10 : vector<8x32xf32> to vector<8x32xbf16>
    %cst_16 = arith.constant dense<0.000000e+00> : vector<8x128xf32>
    %15 = tpu.matmul %14, %1, %cst_16 {dimension_numbers = #tpu.dot_dimension_numbers<[1], [0], [0], [1], [0, 0, 1, 1], [], []>} : vector<8x32xbf16>, vector<32x128xbf16>, vector<8x128xf32> -> vector<8x128xf32>
    %16 = arith.addf %13, %15 : vector<8x128xf32>
    %17 = vector.extract_strided_slice %16 {offsets = [0, 0], sizes = [8, 96], strides = [1, 1]} : vector<8x128xf32> to vector<8x96xf32>
    %18 = arith.negf %17 : vector<8x96xf32>
    %19 = math.exp %18 : vector<8x96xf32>
    %cst_17 = arith.constant 1.000000e+00 : f32
    %20 = vector.broadcast %cst_17 : f32 to vector<8x96xf32>
    %21 = arith.addf %20, %19 : vector<8x96xf32>
    %22 = arith.divf %20, %21 : vector<8x96xf32>
    %23 = vector.extract_strided_slice %16 {offsets = [0, 96], sizes = [8, 32], strides = [1, 1]} : vector<8x128xf32> to vector<8x32xf32>
    %24 = math.tanh %23 : vector<8x32xf32>
    %25 = vector.extract_strided_slice %22 {offsets = [0, 0], sizes = [8, 32], strides = [1, 1]} : vector<8x96xf32> to vector<8x32xf32>
    %26 = vector.extract_strided_slice %22 {offsets = [0, 32], sizes = [8, 32], strides = [1, 1]} : vector<8x96xf32> to vector<8x32xf32>
    %27 = vector.extract_strided_slice %22 {offsets = [0, 64], sizes = [8, 32], strides = [1, 1]} : vector<8x96xf32> to vector<8x32xf32>
    %28 = arith.mulf %26, %11 : vector<8x32xf32>
    %29 = arith.mulf %25, %24 : vector<8x32xf32>
    %30 = arith.addf %28, %29 : vector<8x32xf32>
    %31 = math.tanh %30 : vector<8x32xf32>
    %32 = arith.mulf %27, %31 : vector<8x32xf32>
    %33 = arith.truncf %32 : vector<8x32xf32> to vector<8x32xbf16>
    %c0_18 = arith.constant 0 : index
    %c0_19 = arith.constant 0 : index
    %c0_20 = arith.constant 0 : index
    %34 = vector.load %arg13[%c0_18, %c0_19, %c0_20] : memref<8x8x32xbf16, #tpu.memory_space<vmem>>, vector<1x8x32xbf16>
    %35 = vector.shape_cast %34 : vector<1x8x32xbf16> to vector<8x32xbf16>
    %36 = vector.shape_cast %33 : vector<8x32xbf16> to vector<1x8x32xbf16>
    tpu.vector_store %arg13[%c0_18, %c0_19, %c0_20], %36 {strides = array<i32>} : memref<8x8x32xbf16, #tpu.memory_space<vmem>>, vector<1x8x32xbf16>,
    %c1 = arith.constant 1 : index
    %c0_21 = arith.constant 0 : index
    %c0_22 = arith.constant 0 : index
    %37 = vector.load %arg14[%c1, %c0_21, %c0_22] : memref<8x8x128xf32, #tpu.memory_space<vmem>>, vector<1x8x128xf32>
    %38 = vector.shape_cast %37 : vector<1x8x128xf32> to vector<8x128xf32>
    %39 = arith.truncf %32 : vector<8x32xf32> to vector<8x32xbf16>
    %cst_23 = arith.constant dense<0.000000e+00> : vector<8x128xf32>
    %40 = tpu.matmul %39, %1, %cst_23 {dimension_numbers = #tpu.dot_dimension_numbers<[1], [0], [0], [1], [0, 0, 1, 1], [], []>} : vector<8x32xbf16>, vector<32x128xbf16>, vector<8x128xf32> -> vector<8x128xf32>
    %41 = arith.addf %38, %40 : vector<8x128xf32>
    %42 = vector.extract_strided_slice %41 {offsets = [0, 0], sizes = [8, 96], strides = [1, 1]} : vector<8x128xf32> to vector<8x96xf32>
    %43 = arith.negf %42 : vector<8x96xf32>
    %44 = math.exp %43 : vector<8x96xf32>
    %cst_24 = arith.constant 1.000000e+00 : f32
    %45 = vector.broadcast %cst_24 : f32 to vector<8x96xf32>
    %46 = arith.addf %45, %44 : vector<8x96xf32>
    %47 = arith.divf %45, %46 : vector<8x96xf32>
    %48 = vector.extract_strided_slice %41 {offsets = [0, 96], sizes = [8, 32], strides = [1, 1]} : vector<8x128xf32> to vector<8x32xf32>
    %49 = math.tanh %48 : vector<8x32xf32>
    %50 = vector.extract_strided_slice %47 {offsets = [0, 0], sizes = [8, 32], strides = [1, 1]} : vector<8x96xf32> to vector<8x32xf32>
    %51 = vector.extract_strided_slice %47 {offsets = [0, 32], sizes = [8, 32], strides = [1, 1]} : vector<8x96xf32> to vector<8x32xf32>
    %52 = vector.extract_strided_slice %47 {offsets = [0, 64], sizes = [8, 32], strides = [1, 1]} : vector<8x96xf32> to vector<8x32xf32>
    %53 = arith.mulf %51, %30 : vector<8x32xf32>
    %54 = arith.mulf %50, %49 : vector<8x32xf32>
    %55 = arith.addf %53, %54 : vector<8x32xf32>
    %56 = math.tanh %55 : vector<8x32xf32>
    %57 = arith.mulf %52, %56 : vector<8x32xf32>
    %58 = arith.truncf %57 : vector<8x32xf32> to vector<8x32xbf16>
    %c1_25 = arith.constant 1 : index
    %c0_26 = arith.constant 0 : index
    %c0_27 = arith.constant 0 : index
    %59 = vector.load %arg13[%c1_25, %c0_26, %c0_27] : memref<8x8x32xbf16, #tpu.memory_space<vmem>>, vector<1x8x32xbf16>
    %60 = vector.shape_cast %59 : vector<1x8x32xbf16> to vector<8x32xbf16>
    %61 = vector.shape_cast %58 : vector<8x32xbf16> to vector<1x8x32xbf16>
    tpu.vector_store %arg13[%c1_25, %c0_26, %c0_27], %61 {strides = array<i32>} : memref<8x8x32xbf16, #tpu.memory_space<vmem>>, vector<1x8x32xbf16>,
    %c2 = arith.constant 2 : index
    %c0_28 = arith.constant 0 : index
    %c0_29 = arith.constant 0 : index
    %62 = vector.load %arg14[%c2, %c0_28, %c0_29] : memref<8x8x128xf32, #tpu.memory_space<vmem>>, vector<1x8x128xf32>
    %63 = vector.shape_cast %62 : vector<1x8x128xf32> to vector<8x128xf32>
    %64 = arith.truncf %57 : vector<8x32xf32> to vector<8x32xbf16>
    %cst_30 = arith.constant dense<0.000000e+00> : vector<8x128xf32>
    %65 = tpu.matmul %64, %1, %cst_30 {dimension_numbers = #tpu.dot_dimension_numbers<[1], [0], [0], [1], [0, 0, 1, 1], [], []>} : vector<8x32xbf16>, vector<32x128xbf16>, vector<8x128xf32> -> vector<8x128xf32>
    %66 = arith.addf %63, %65 : vector<8x128xf32>
    %67 = vector.extract_strided_slice %66 {offsets = [0, 0], sizes = [8, 96], strides = [1, 1]} : vector<8x128xf32> to vector<8x96xf32>
    %68 = arith.negf %67 : vector<8x96xf32>
    %69 = math.exp %68 : vector<8x96xf32>
    %cst_31 = arith.constant 1.000000e+00 : f32
    %70 = vector.broadcast %cst_31 : f32 to vector<8x96xf32>
    %71 = arith.addf %70, %69 : vector<8x96xf32>
    %72 = arith.divf %70, %71 : vector<8x96xf32>
    %73 = vector.extract_strided_slice %66 {offsets = [0, 96], sizes = [8, 32], strides = [1, 1]} : vector<8x128xf32> to vector<8x32xf32>
    %74 = math.tanh %73 : vector<8x32xf32>
    %75 = vector.extract_strided_slice %72 {offsets = [0, 0], sizes = [8, 32], strides = [1, 1]} : vector<8x96xf32> to vector<8x32xf32>
    %76 = vector.extract_strided_slice %72 {offsets = [0, 32], sizes = [8, 32], strides = [1, 1]} : vector<8x96xf32> to vector<8x32xf32>
    %77 = vector.extract_strided_slice %72 {offsets = [0, 64], sizes = [8, 32], strides = [1, 1]} : vector<8x96xf32> to vector<8x32xf32>
    %78 = arith.mulf %76, %55 : vector<8x32xf32>
    %79 = arith.mulf %75, %74 : vector<8x32xf32>
    %80 = arith.addf %78, %79 : vector<8x32xf32>
    %81 = math.tanh %80 : vector<8x32xf32>
    %82 = arith.mulf %77, %81 : vector<8x32xf32>
    %83 = arith.truncf %82 : vector<8x32xf32> to vector<8x32xbf16>
    %c2_32 = arith.constant 2 : index
    %c0_33 = arith.constant 0 : index
    %c0_34 = arith.constant 0 : index
    %84 = vector.load %arg13[%c2_32, %c0_33, %c0_34] : memref<8x8x32xbf16, #tpu.memory_space<vmem>>, vector<1x8x32xbf16>
    %85 = vector.shape_cast %84 : vector<1x8x32xbf16> to vector<8x32xbf16>
    %86 = vector.shape_cast %83 : vector<8x32xbf16> to vector<1x8x32xbf16>
    tpu.vector_store %arg13[%c2_32, %c0_33, %c0_34], %86 {strides = array<i32>} : memref<8x8x32xbf16, #tpu.memory_space<vmem>>, vector<1x8x32xbf16>,
    %c3 = arith.constant 3 : index
    %c0_35 = arith.constant 0 : index
    %c0_36 = arith.constant 0 : index
    %87 = vector.load %arg14[%c3, %c0_35, %c0_36] : memref<8x8x128xf32, #tpu.memory_space<vmem>>, vector<1x8x128xf32>
    %88 = vector.shape_cast %87 : vector<1x8x128xf32> to vector<8x128xf32>
    %89 = arith.truncf %82 : vector<8x32xf32> to vector<8x32xbf16>
    %cst_37 = arith.constant dense<0.000000e+00> : vector<8x128xf32>
    %90 = tpu.matmul %89, %1, %cst_37 {dimension_numbers = #tpu.dot_dimension_numbers<[1], [0], [0], [1], [0, 0, 1, 1], [], []>} : vector<8x32xbf16>, vector<32x128xbf16>, vector<8x128xf32> -> vector<8x128xf32>
    %91 = arith.addf %88, %90 : vector<8x128xf32>
    %92 = vector.extract_strided_slice %91 {offsets = [0, 0], sizes = [8, 96], strides = [1, 1]} : vector<8x128xf32> to vector<8x96xf32>
    %93 = arith.negf %92 : vector<8x96xf32>
    %94 = math.exp %93 : vector<8x96xf32>
    %cst_38 = arith.constant 1.000000e+00 : f32
    %95 = vector.broadcast %cst_38 : f32 to vector<8x96xf32>
    %96 = arith.addf %95, %94 : vector<8x96xf32>
    %97 = arith.divf %95, %96 : vector<8x96xf32>
    %98 = vector.extract_strided_slice %91 {offsets = [0, 96], sizes = [8, 32], strides = [1, 1]} : vector<8x128xf32> to vector<8x32xf32>
    %99 = math.tanh %98 : vector<8x32xf32>
    %100 = vector.extract_strided_slice %97 {offsets = [0, 0], sizes = [8, 32], strides = [1, 1]} : vector<8x96xf32> to vector<8x32xf32>
    %101 = vector.extract_strided_slice %97 {offsets = [0, 32], sizes = [8, 32], strides = [1, 1]} : vector<8x96xf32> to vector<8x32xf32>
    %102 = vector.extract_strided_slice %97 {offsets = [0, 64], sizes = [8, 32], strides = [1, 1]} : vector<8x96xf32> to vector<8x32xf32>
    %103 = arith.mulf %101, %80 : vector<8x32xf32>
    %104 = arith.mulf %100, %99 : vector<8x32xf32>
    %105 = arith.addf %103, %104 : vector<8x32xf32>
    %106 = math.tanh %105 : vector<8x32xf32>
    %107 = arith.mulf %102, %106 : vector<8x32xf32>
    %108 = arith.truncf %107 : vector<8x32xf32> to vector<8x32xbf16>
    %c3_39 = arith.constant 3 : index
    %c0_40 = arith.constant 0 : index
    %c0_41 = arith.constant 0 : index
    %109 = vector.load %arg13[%c3_39, %c0_40, %c0_41] : memref<8x8x32xbf16, #tpu.memory_space<vmem>>, vector<1x8x32xbf16>
    %110 = vector.shape_cast %109 : vector<1x8x32xbf16> to vector<8x32xbf16>
    %111 = vector.shape_cast %108 : vector<8x32xbf16> to vector<1x8x32xbf16>
    tpu.vector_store %arg13[%c3_39, %c0_40, %c0_41], %111 {strides = array<i32>} : memref<8x8x32xbf16, #tpu.memory_space<vmem>>, vector<1x8x32xbf16>,
    %c4 = arith.constant 4 : index
    %c0_42 = arith.constant 0 : index
    %c0_43 = arith.constant 0 : index
    %112 = vector.load %arg14[%c4, %c0_42, %c0_43] : memref<8x8x128xf32, #tpu.memory_space<vmem>>, vector<1x8x128xf32>
    %113 = vector.shape_cast %112 : vector<1x8x128xf32> to vector<8x128xf32>
    %114 = arith.truncf %107 : vector<8x32xf32> to vector<8x32xbf16>
    %cst_44 = arith.constant dense<0.000000e+00> : vector<8x128xf32>
    %115 = tpu.matmul %114, %1, %cst_44 {dimension_numbers = #tpu.dot_dimension_numbers<[1], [0], [0], [1], [0, 0, 1, 1], [], []>} : vector<8x32xbf16>, vector<32x128xbf16>, vector<8x128xf32> -> vector<8x128xf32>
    %116 = arith.addf %113, %115 : vector<8x128xf32>
    %117 = vector.extract_strided_slice %116 {offsets = [0, 0], sizes = [8, 96], strides = [1, 1]} : vector<8x128xf32> to vector<8x96xf32>
    %118 = arith.negf %117 : vector<8x96xf32>
    %119 = math.exp %118 : vector<8x96xf32>
    %cst_45 = arith.constant 1.000000e+00 : f32
    %120 = vector.broadcast %cst_45 : f32 to vector<8x96xf32>
    %121 = arith.addf %120, %119 : vector<8x96xf32>
    %122 = arith.divf %120, %121 : vector<8x96xf32>
    %123 = vector.extract_strided_slice %116 {offsets = [0, 96], sizes = [8, 32], strides = [1, 1]} : vector<8x128xf32> to vector<8x32xf32>
    %124 = math.tanh %123 : vector<8x32xf32>
    %125 = vector.extract_strided_slice %122 {offsets = [0, 0], sizes = [8, 32], strides = [1, 1]} : vector<8x96xf32> to vector<8x32xf32>
    %126 = vector.extract_strided_slice %122 {offsets = [0, 32], sizes = [8, 32], strides = [1, 1]} : vector<8x96xf32> to vector<8x32xf32>
    %127 = vector.extract_strided_slice %122 {offsets = [0, 64], sizes = [8, 32], strides = [1, 1]} : vector<8x96xf32> to vector<8x32xf32>
    %128 = arith.mulf %126, %105 : vector<8x32xf32>
    %129 = arith.mulf %125, %124 : vector<8x32xf32>
    %130 = arith.addf %128, %129 : vector<8x32xf32>
    %131 = math.tanh %130 : vector<8x32xf32>
    %132 = arith.mulf %127, %131 : vector<8x32xf32>
    %133 = arith.truncf %132 : vector<8x32xf32> to vector<8x32xbf16>
    %c4_46 = arith.constant 4 : index
    %c0_47 = arith.constant 0 : index
    %c0_48 = arith.constant 0 : index
    %134 = vector.load %arg13[%c4_46, %c0_47, %c0_48] : memref<8x8x32xbf16, #tpu.memory_space<vmem>>, vector<1x8x32xbf16>
    %135 = vector.shape_cast %134 : vector<1x8x32xbf16> to vector<8x32xbf16>
    %136 = vector.shape_cast %133 : vector<8x32xbf16> to vector<1x8x32xbf16>
    tpu.vector_store %arg13[%c4_46, %c0_47, %c0_48], %136 {strides = array<i32>} : memref<8x8x32xbf16, #tpu.memory_space<vmem>>, vector<1x8x32xbf16>,
    %c5 = arith.constant 5 : index
    %c0_49 = arith.constant 0 : index
    %c0_50 = arith.constant 0 : index
    %137 = vector.load %arg14[%c5, %c0_49, %c0_50] : memref<8x8x128xf32, #tpu.memory_space<vmem>>, vector<1x8x128xf32>
    %138 = vector.shape_cast %137 : vector<1x8x128xf32> to vector<8x128xf32>
    %139 = arith.truncf %132 : vector<8x32xf32> to vector<8x32xbf16>
    %cst_51 = arith.constant dense<0.000000e+00> : vector<8x128xf32>
    %140 = tpu.matmul %139, %1, %cst_51 {dimension_numbers = #tpu.dot_dimension_numbers<[1], [0], [0], [1], [0, 0, 1, 1], [], []>} : vector<8x32xbf16>, vector<32x128xbf16>, vector<8x128xf32> -> vector<8x128xf32>
    %141 = arith.addf %138, %140 : vector<8x128xf32>
    %142 = vector.extract_strided_slice %141 {offsets = [0, 0], sizes = [8, 96], strides = [1, 1]} : vector<8x128xf32> to vector<8x96xf32>
    %143 = arith.negf %142 : vector<8x96xf32>
    %144 = math.exp %143 : vector<8x96xf32>
    %cst_52 = arith.constant 1.000000e+00 : f32
    %145 = vector.broadcast %cst_52 : f32 to vector<8x96xf32>
    %146 = arith.addf %145, %144 : vector<8x96xf32>
    %147 = arith.divf %145, %146 : vector<8x96xf32>
    %148 = vector.extract_strided_slice %141 {offsets = [0, 96], sizes = [8, 32], strides = [1, 1]} : vector<8x128xf32> to vector<8x32xf32>
    %149 = math.tanh %148 : vector<8x32xf32>
    %150 = vector.extract_strided_slice %147 {offsets = [0, 0], sizes = [8, 32], strides = [1, 1]} : vector<8x96xf32> to vector<8x32xf32>
    %151 = vector.extract_strided_slice %147 {offsets = [0, 32], sizes = [8, 32], strides = [1, 1]} : vector<8x96xf32> to vector<8x32xf32>
    %152 = vector.extract_strided_slice %147 {offsets = [0, 64], sizes = [8, 32], strides = [1, 1]} : vector<8x96xf32> to vector<8x32xf32>
    %153 = arith.mulf %151, %130 : vector<8x32xf32>
    %154 = arith.mulf %150, %149 : vector<8x32xf32>
    %155 = arith.addf %153, %154 : vector<8x32xf32>
    %156 = math.tanh %155 : vector<8x32xf32>
    %157 = arith.mulf %152, %156 : vector<8x32xf32>
    %158 = arith.truncf %157 : vector<8x32xf32> to vector<8x32xbf16>
    %c5_53 = arith.constant 5 : index
    %c0_54 = arith.constant 0 : index
    %c0_55 = arith.constant 0 : index
    %159 = vector.load %arg13[%c5_53, %c0_54, %c0_55] : memref<8x8x32xbf16, #tpu.memory_space<vmem>>, vector<1x8x32xbf16>
    %160 = vector.shape_cast %159 : vector<1x8x32xbf16> to vector<8x32xbf16>
    %161 = vector.shape_cast %158 : vector<8x32xbf16> to vector<1x8x32xbf16>
    tpu.vector_store %arg13[%c5_53, %c0_54, %c0_55], %161 {strides = array<i32>} : memref<8x8x32xbf16, #tpu.memory_space<vmem>>, vector<1x8x32xbf16>,
    %c6 = arith.constant 6 : index
    %c0_56 = arith.constant 0 : index
    %c0_57 = arith.constant 0 : index
    %162 = vector.load %arg14[%c6, %c0_56, %c0_57] : memref<8x8x128xf32, #tpu.memory_space<vmem>>, vector<1x8x128xf32>
    %163 = vector.shape_cast %162 : vector<1x8x128xf32> to vector<8x128xf32>
    %164 = arith.truncf %157 : vector<8x32xf32> to vector<8x32xbf16>
    %cst_58 = arith.constant dense<0.000000e+00> : vector<8x128xf32>
    %165 = tpu.matmul %164, %1, %cst_58 {dimension_numbers = #tpu.dot_dimension_numbers<[1], [0], [0], [1], [0, 0, 1, 1], [], []>} : vector<8x32xbf16>, vector<32x128xbf16>, vector<8x128xf32> -> vector<8x128xf32>
    %166 = arith.addf %163, %165 : vector<8x128xf32>
    %167 = vector.extract_strided_slice %166 {offsets = [0, 0], sizes = [8, 96], strides = [1, 1]} : vector<8x128xf32> to vector<8x96xf32>
    %168 = arith.negf %167 : vector<8x96xf32>
    %169 = math.exp %168 : vector<8x96xf32>
    %cst_59 = arith.constant 1.000000e+00 : f32
    %170 = vector.broadcast %cst_59 : f32 to vector<8x96xf32>
    %171 = arith.addf %170, %169 : vector<8x96xf32>
    %172 = arith.divf %170, %171 : vector<8x96xf32>
    %173 = vector.extract_strided_slice %166 {offsets = [0, 96], sizes = [8, 32], strides = [1, 1]} : vector<8x128xf32> to vector<8x32xf32>
    %174 = math.tanh %173 : vector<8x32xf32>
    %175 = vector.extract_strided_slice %172 {offsets = [0, 0], sizes = [8, 32], strides = [1, 1]} : vector<8x96xf32> to vector<8x32xf32>
    %176 = vector.extract_strided_slice %172 {offsets = [0, 32], sizes = [8, 32], strides = [1, 1]} : vector<8x96xf32> to vector<8x32xf32>
    %177 = vector.extract_strided_slice %172 {offsets = [0, 64], sizes = [8, 32], strides = [1, 1]} : vector<8x96xf32> to vector<8x32xf32>
    %178 = arith.mulf %176, %155 : vector<8x32xf32>
    %179 = arith.mulf %175, %174 : vector<8x32xf32>
    %180 = arith.addf %178, %179 : vector<8x32xf32>
    %181 = math.tanh %180 : vector<8x32xf32>
    %182 = arith.mulf %177, %181 : vector<8x32xf32>
    %183 = arith.truncf %182 : vector<8x32xf32> to vector<8x32xbf16>
    %c6_60 = arith.constant 6 : index
    %c0_61 = arith.constant 0 : index
    %c0_62 = arith.constant 0 : index
    %184 = vector.load %arg13[%c6_60, %c0_61, %c0_62] : memref<8x8x32xbf16, #tpu.memory_space<vmem>>, vector<1x8x32xbf16>
    %185 = vector.shape_cast %184 : vector<1x8x32xbf16> to vector<8x32xbf16>
    %186 = vector.shape_cast %183 : vector<8x32xbf16> to vector<1x8x32xbf16>
    tpu.vector_store %arg13[%c6_60, %c0_61, %c0_62], %186 {strides = array<i32>} : memref<8x8x32xbf16, #tpu.memory_space<vmem>>, vector<1x8x32xbf16>,
    %c7 = arith.constant 7 : index
    %c0_63 = arith.constant 0 : index
    %c0_64 = arith.constant 0 : index
    %187 = vector.load %arg14[%c7, %c0_63, %c0_64] : memref<8x8x128xf32, #tpu.memory_space<vmem>>, vector<1x8x128xf32>
    %188 = vector.shape_cast %187 : vector<1x8x128xf32> to vector<8x128xf32>
    %189 = arith.truncf %182 : vector<8x32xf32> to vector<8x32xbf16>
    %cst_65 = arith.constant dense<0.000000e+00> : vector<8x128xf32>
    %190 = tpu.matmul %189, %1, %cst_65 {dimension_numbers = #tpu.dot_dimension_numbers<[1], [0], [0], [1], [0, 0, 1, 1], [], []>} : vector<8x32xbf16>, vector<32x128xbf16>, vector<8x128xf32> -> vector<8x128xf32>
    %191 = arith.addf %188, %190 : vector<8x128xf32>
    %192 = vector.extract_strided_slice %191 {offsets = [0, 0], sizes = [8, 96], strides = [1, 1]} : vector<8x128xf32> to vector<8x96xf32>
    %193 = arith.negf %192 : vector<8x96xf32>
    %194 = math.exp %193 : vector<8x96xf32>
    %cst_66 = arith.constant 1.000000e+00 : f32
    %195 = vector.broadcast %cst_66 : f32 to vector<8x96xf32>
    %196 = arith.addf %195, %194 : vector<8x96xf32>
    %197 = arith.divf %195, %196 : vector<8x96xf32>
    %198 = vector.extract_strided_slice %191 {offsets = [0, 96], sizes = [8, 32], strides = [1, 1]} : vector<8x128xf32> to vector<8x32xf32>
    %199 = math.tanh %198 : vector<8x32xf32>
    %200 = vector.extract_strided_slice %197 {offsets = [0, 0], sizes = [8, 32], strides = [1, 1]} : vector<8x96xf32> to vector<8x32xf32>
    %201 = vector.extract_strided_slice %197 {offsets = [0, 32], sizes = [8, 32], strides = [1, 1]} : vector<8x96xf32> to vector<8x32xf32>
    %202 = vector.extract_strided_slice %197 {offsets = [0, 64], sizes = [8, 32], strides = [1, 1]} : vector<8x96xf32> to vector<8x32xf32>
    %203 = arith.mulf %201, %180 : vector<8x32xf32>
    %204 = arith.mulf %200, %199 : vector<8x32xf32>
    %205 = arith.addf %203, %204 : vector<8x32xf32>
    %206 = math.tanh %205 : vector<8x32xf32>
    %207 = arith.mulf %202, %206 : vector<8x32xf32>
    %208 = arith.truncf %207 : vector<8x32xf32> to vector<8x32xbf16>
    %c7_67 = arith.constant 7 : index
    %c0_68 = arith.constant 0 : index
    %c0_69 = arith.constant 0 : index
    %209 = vector.load %arg13[%c7_67, %c0_68, %c0_69] : memref<8x8x32xbf16, #tpu.memory_space<vmem>>, vector<1x8x32xbf16>
    %210 = vector.shape_cast %209 : vector<1x8x32xbf16> to vector<8x32xbf16>
    %211 = vector.shape_cast %208 : vector<8x32xbf16> to vector<1x8x32xbf16>
    tpu.vector_store %arg13[%c7_67, %c0_68, %c0_69], %211 {strides = array<i32>} : memref<8x8x32xbf16, #tpu.memory_space<vmem>>, vector<1x8x32xbf16>,
    %c0_70 = arith.constant 0 : index
    %c0_71 = arith.constant 0 : index
    %c0_72 = arith.constant 0 : index
    %212 = vector.load %arg11[%c0_70, %c0_71, %c0_72] : memref<2x8x32xf32, #tpu.memory_space<vmem>>, vector<1x8x32xf32>
    %213 = vector.shape_cast %212 : vector<1x8x32xf32> to vector<8x32xf32>
    %214 = vector.shape_cast %207 : vector<8x32xf32> to vector<1x8x32xf32>
    tpu.vector_store %arg11[%c0_70, %c0_71, %c0_72], %214 {strides = array<i32>} : memref<2x8x32xf32, #tpu.memory_space<vmem>>, vector<1x8x32xf32>,
    %c0_73 = arith.constant 0 : index
    %c0_74 = arith.constant 0 : index
    %c0_75 = arith.constant 0 : index
    %215 = vector.load %arg12[%c0_73, %c0_74, %c0_75] : memref<2x8x32xf32, #tpu.memory_space<vmem>>, vector<1x8x32xf32>
    %216 = vector.shape_cast %215 : vector<1x8x32xf32> to vector<8x32xf32>
    %217 = vector.shape_cast %205 : vector<8x32xf32> to vector<1x8x32xf32>
    tpu.vector_store %arg12[%c0_73, %c0_74, %c0_75], %217 {strides = array<i32>} : memref<2x8x32xf32, #tpu.memory_space<vmem>>, vector<1x8x32xf32>,
    %c0_76 = arith.constant 0 : index
    %c0_77 = arith.constant 0 : index
    %218 = vector.load %arg5[%c0_76, %c0_77] : memref<32x128xbf16, #tpu.memory_space<vmem>>, vector<32x128xbf16>
    %c0_78 = arith.constant 0 : index
    %c0_79 = arith.constant 0 : index
    %219 = vector.load %arg6[%c0_78, %c0_79] : memref<32x128xbf16, #tpu.memory_space<vmem>>, vector<32x128xbf16>
    %c0_80 = arith.constant 0 : index
    %c0_81 = arith.constant 0 : index
    %220 = vector.load %arg7[%c0_80, %c0_81] : memref<1x128xf32, #tpu.memory_space<vmem>>, vector<1x128xf32>
    %c0_82 = arith.constant 0 : index
    %c0_83 = arith.constant 0 : index
    %c0_84 = arith.constant 0 : index
    %221 = vector.load %arg13[%c0_82, %c0_83, %c0_84] : memref<8x8x32xbf16, #tpu.memory_space<vmem>>, vector<8x8x32xbf16>
    %222 = vector.shape_cast %221 : vector<8x8x32xbf16> to vector<64x32xbf16>
    %cst_85 = arith.constant dense<0.000000e+00> : vector<64x128xf32>
    %223 = tpu.matmul %222, %218, %cst_85 {dimension_numbers = #tpu.dot_dimension_numbers<[1], [0], [0], [1], [0, 0, 1, 1], [], []>} : vector<64x32xbf16>, vector<32x128xbf16>, vector<64x128xf32> -> vector<64x128xf32>
    %224 = vector.broadcast %220 : vector<1x128xf32> to vector<64x128xf32>
    %225 = arith.addf %223, %224 : vector<64x128xf32>
    %226 = vector.shape_cast %225 : vector<64x128xf32> to vector<8x8x128xf32>
    %c0_86 = arith.constant 0 : index
    %c0_87 = arith.constant 0 : index
    %c0_88 = arith.constant 0 : index
    %227 = vector.load %arg14[%c0_86, %c0_87, %c0_88] : memref<8x8x128xf32, #tpu.memory_space<vmem>>, vector<8x8x128xf32>
    tpu.vector_store %arg14[%c0_86, %c0_87, %c0_88], %226 {strides = array<i32>} : memref<8x8x128xf32, #tpu.memory_space<vmem>>, vector<8x8x128xf32>,
    %cst_89 = arith.constant 0.000000e+00 : f32
    %228 = vector.broadcast %cst_89 : f32 to vector<8x32xf32>
    %cst_90 = arith.constant 0.000000e+00 : f32
    %229 = vector.broadcast %cst_90 : f32 to vector<8x32xf32>
    %c0_91 = arith.constant 0 : index
    %c0_92 = arith.constant 0 : index
    %c0_93 = arith.constant 0 : index
    %230 = vector.load %arg14[%c0_91, %c0_92, %c0_93] : memref<8x8x128xf32, #tpu.memory_space<vmem>>, vector<1x8x128xf32>
    %231 = vector.shape_cast %230 : vector<1x8x128xf32> to vector<8x128xf32>
    %232 = arith.truncf %228 : vector<8x32xf32> to vector<8x32xbf16>
    %cst_94 = arith.constant dense<0.000000e+00> : vector<8x128xf32>
    %233 = tpu.matmul %232, %219, %cst_94 {dimension_numbers = #tpu.dot_dimension_numbers<[1], [0], [0], [1], [0, 0, 1, 1], [], []>} : vector<8x32xbf16>, vector<32x128xbf16>, vector<8x128xf32> -> vector<8x128xf32>
    %234 = arith.addf %231, %233 : vector<8x128xf32>
    %235 = vector.extract_strided_slice %234 {offsets = [0, 0], sizes = [8, 96], strides = [1, 1]} : vector<8x128xf32> to vector<8x96xf32>
    %236 = arith.negf %235 : vector<8x96xf32>
    %237 = math.exp %236 : vector<8x96xf32>
    %cst_95 = arith.constant 1.000000e+00 : f32
    %238 = vector.broadcast %cst_95 : f32 to vector<8x96xf32>
    %239 = arith.addf %238, %237 : vector<8x96xf32>
    %240 = arith.divf %238, %239 : vector<8x96xf32>
    %241 = vector.extract_strided_slice %234 {offsets = [0, 96], sizes = [8, 32], strides = [1, 1]} : vector<8x128xf32> to vector<8x32xf32>
    %242 = math.tanh %241 : vector<8x32xf32>
    %243 = vector.extract_strided_slice %240 {offsets = [0, 0], sizes = [8, 32], strides = [1, 1]} : vector<8x96xf32> to vector<8x32xf32>
    %244 = vector.extract_strided_slice %240 {offsets = [0, 32], sizes = [8, 32], strides = [1, 1]} : vector<8x96xf32> to vector<8x32xf32>
    %245 = vector.extract_strided_slice %240 {offsets = [0, 64], sizes = [8, 32], strides = [1, 1]} : vector<8x96xf32> to vector<8x32xf32>
    %246 = arith.mulf %244, %229 : vector<8x32xf32>
    %247 = arith.mulf %243, %242 : vector<8x32xf32>
    %248 = arith.addf %246, %247 : vector<8x32xf32>
    %249 = math.tanh %248 : vector<8x32xf32>
    %250 = arith.mulf %245, %249 : vector<8x32xf32>
    %c1_96 = arith.constant 1 : index
    %c0_97 = arith.constant 0 : index
    %c0_98 = arith.constant 0 : index
    %251 = vector.load %arg14[%c1_96, %c0_97, %c0_98] : memref<8x8x128xf32, #tpu.memory_space<vmem>>, vector<1x8x128xf32>
    %252 = vector.shape_cast %251 : vector<1x8x128xf32> to vector<8x128xf32>
    %253 = arith.truncf %250 : vector<8x32xf32> to vector<8x32xbf16>
    %cst_99 = arith.constant dense<0.000000e+00> : vector<8x128xf32>
    %254 = tpu.matmul %253, %219, %cst_99 {dimension_numbers = #tpu.dot_dimension_numbers<[1], [0], [0], [1], [0, 0, 1, 1], [], []>} : vector<8x32xbf16>, vector<32x128xbf16>, vector<8x128xf32> -> vector<8x128xf32>
    %255 = arith.addf %252, %254 : vector<8x128xf32>
    %256 = vector.extract_strided_slice %255 {offsets = [0, 0], sizes = [8, 96], strides = [1, 1]} : vector<8x128xf32> to vector<8x96xf32>
    %257 = arith.negf %256 : vector<8x96xf32>
    %258 = math.exp %257 : vector<8x96xf32>
    %cst_100 = arith.constant 1.000000e+00 : f32
    %259 = vector.broadcast %cst_100 : f32 to vector<8x96xf32>
    %260 = arith.addf %259, %258 : vector<8x96xf32>
    %261 = arith.divf %259, %260 : vector<8x96xf32>
    %262 = vector.extract_strided_slice %255 {offsets = [0, 96], sizes = [8, 32], strides = [1, 1]} : vector<8x128xf32> to vector<8x32xf32>
    %263 = math.tanh %262 : vector<8x32xf32>
    %264 = vector.extract_strided_slice %261 {offsets = [0, 0], sizes = [8, 32], strides = [1, 1]} : vector<8x96xf32> to vector<8x32xf32>
    %265 = vector.extract_strided_slice %261 {offsets = [0, 32], sizes = [8, 32], strides = [1, 1]} : vector<8x96xf32> to vector<8x32xf32>
    %266 = vector.extract_strided_slice %261 {offsets = [0, 64], sizes = [8, 32], strides = [1, 1]} : vector<8x96xf32> to vector<8x32xf32>
    %267 = arith.mulf %265, %248 : vector<8x32xf32>
    %268 = arith.mulf %264, %263 : vector<8x32xf32>
    %269 = arith.addf %267, %268 : vector<8x32xf32>
    %270 = math.tanh %269 : vector<8x32xf32>
    %271 = arith.mulf %266, %270 : vector<8x32xf32>
    %c2_101 = arith.constant 2 : index
    %c0_102 = arith.constant 0 : index
    %c0_103 = arith.constant 0 : index
    %272 = vector.load %arg14[%c2_101, %c0_102, %c0_103] : memref<8x8x128xf32, #tpu.memory_space<vmem>>, vector<1x8x128xf32>
    %273 = vector.shape_cast %272 : vector<1x8x128xf32> to vector<8x128xf32>
    %274 = arith.truncf %271 : vector<8x32xf32> to vector<8x32xbf16>
    %cst_104 = arith.constant dense<0.000000e+00> : vector<8x128xf32>
    %275 = tpu.matmul %274, %219, %cst_104 {dimension_numbers = #tpu.dot_dimension_numbers<[1], [0], [0], [1], [0, 0, 1, 1], [], []>} : vector<8x32xbf16>, vector<32x128xbf16>, vector<8x128xf32> -> vector<8x128xf32>
    %276 = arith.addf %273, %275 : vector<8x128xf32>
    %277 = vector.extract_strided_slice %276 {offsets = [0, 0], sizes = [8, 96], strides = [1, 1]} : vector<8x128xf32> to vector<8x96xf32>
    %278 = arith.negf %277 : vector<8x96xf32>
    %279 = math.exp %278 : vector<8x96xf32>
    %cst_105 = arith.constant 1.000000e+00 : f32
    %280 = vector.broadcast %cst_105 : f32 to vector<8x96xf32>
    %281 = arith.addf %280, %279 : vector<8x96xf32>
    %282 = arith.divf %280, %281 : vector<8x96xf32>
    %283 = vector.extract_strided_slice %276 {offsets = [0, 96], sizes = [8, 32], strides = [1, 1]} : vector<8x128xf32> to vector<8x32xf32>
    %284 = math.tanh %283 : vector<8x32xf32>
    %285 = vector.extract_strided_slice %282 {offsets = [0, 0], sizes = [8, 32], strides = [1, 1]} : vector<8x96xf32> to vector<8x32xf32>
    %286 = vector.extract_strided_slice %282 {offsets = [0, 32], sizes = [8, 32], strides = [1, 1]} : vector<8x96xf32> to vector<8x32xf32>
    %287 = vector.extract_strided_slice %282 {offsets = [0, 64], sizes = [8, 32], strides = [1, 1]} : vector<8x96xf32> to vector<8x32xf32>
    %288 = arith.mulf %286, %269 : vector<8x32xf32>
    %289 = arith.mulf %285, %284 : vector<8x32xf32>
    %290 = arith.addf %288, %289 : vector<8x32xf32>
    %291 = math.tanh %290 : vector<8x32xf32>
    %292 = arith.mulf %287, %291 : vector<8x32xf32>
    %c3_106 = arith.constant 3 : index
    %c0_107 = arith.constant 0 : index
    %c0_108 = arith.constant 0 : index
    %293 = vector.load %arg14[%c3_106, %c0_107, %c0_108] : memref<8x8x128xf32, #tpu.memory_space<vmem>>, vector<1x8x128xf32>
    %294 = vector.shape_cast %293 : vector<1x8x128xf32> to vector<8x128xf32>
    %295 = arith.truncf %292 : vector<8x32xf32> to vector<8x32xbf16>
    %cst_109 = arith.constant dense<0.000000e+00> : vector<8x128xf32>
    %296 = tpu.matmul %295, %219, %cst_109 {dimension_numbers = #tpu.dot_dimension_numbers<[1], [0], [0], [1], [0, 0, 1, 1], [], []>} : vector<8x32xbf16>, vector<32x128xbf16>, vector<8x128xf32> -> vector<8x128xf32>
    %297 = arith.addf %294, %296 : vector<8x128xf32>
    %298 = vector.extract_strided_slice %297 {offsets = [0, 0], sizes = [8, 96], strides = [1, 1]} : vector<8x128xf32> to vector<8x96xf32>
    %299 = arith.negf %298 : vector<8x96xf32>
    %300 = math.exp %299 : vector<8x96xf32>
    %cst_110 = arith.constant 1.000000e+00 : f32
    %301 = vector.broadcast %cst_110 : f32 to vector<8x96xf32>
    %302 = arith.addf %301, %300 : vector<8x96xf32>
    %303 = arith.divf %301, %302 : vector<8x96xf32>
    %304 = vector.extract_strided_slice %297 {offsets = [0, 96], sizes = [8, 32], strides = [1, 1]} : vector<8x128xf32> to vector<8x32xf32>
    %305 = math.tanh %304 : vector<8x32xf32>
    %306 = vector.extract_strided_slice %303 {offsets = [0, 0], sizes = [8, 32], strides = [1, 1]} : vector<8x96xf32> to vector<8x32xf32>
    %307 = vector.extract_strided_slice %303 {offsets = [0, 32], sizes = [8, 32], strides = [1, 1]} : vector<8x96xf32> to vector<8x32xf32>
    %308 = vector.extract_strided_slice %303 {offsets = [0, 64], sizes = [8, 32], strides = [1, 1]} : vector<8x96xf32> to vector<8x32xf32>
    %309 = arith.mulf %307, %290 : vector<8x32xf32>
    %310 = arith.mulf %306, %305 : vector<8x32xf32>
    %311 = arith.addf %309, %310 : vector<8x32xf32>
    %312 = math.tanh %311 : vector<8x32xf32>
    %313 = arith.mulf %308, %312 : vector<8x32xf32>
    %c4_111 = arith.constant 4 : index
    %c0_112 = arith.constant 0 : index
    %c0_113 = arith.constant 0 : index
    %314 = vector.load %arg14[%c4_111, %c0_112, %c0_113] : memref<8x8x128xf32, #tpu.memory_space<vmem>>, vector<1x8x128xf32>
    %315 = vector.shape_cast %314 : vector<1x8x128xf32> to vector<8x128xf32>
    %316 = arith.truncf %313 : vector<8x32xf32> to vector<8x32xbf16>
    %cst_114 = arith.constant dense<0.000000e+00> : vector<8x128xf32>
    %317 = tpu.matmul %316, %219, %cst_114 {dimension_numbers = #tpu.dot_dimension_numbers<[1], [0], [0], [1], [0, 0, 1, 1], [], []>} : vector<8x32xbf16>, vector<32x128xbf16>, vector<8x128xf32> -> vector<8x128xf32>
    %318 = arith.addf %315, %317 : vector<8x128xf32>
    %319 = vector.extract_strided_slice %318 {offsets = [0, 0], sizes = [8, 96], strides = [1, 1]} : vector<8x128xf32> to vector<8x96xf32>
    %320 = arith.negf %319 : vector<8x96xf32>
    %321 = math.exp %320 : vector<8x96xf32>
    %cst_115 = arith.constant 1.000000e+00 : f32
    %322 = vector.broadcast %cst_115 : f32 to vector<8x96xf32>
    %323 = arith.addf %322, %321 : vector<8x96xf32>
    %324 = arith.divf %322, %323 : vector<8x96xf32>
    %325 = vector.extract_strided_slice %318 {offsets = [0, 96], sizes = [8, 32], strides = [1, 1]} : vector<8x128xf32> to vector<8x32xf32>
    %326 = math.tanh %325 : vector<8x32xf32>
    %327 = vector.extract_strided_slice %324 {offsets = [0, 0], sizes = [8, 32], strides = [1, 1]} : vector<8x96xf32> to vector<8x32xf32>
    %328 = vector.extract_strided_slice %324 {offsets = [0, 32], sizes = [8, 32], strides = [1, 1]} : vector<8x96xf32> to vector<8x32xf32>
    %329 = vector.extract_strided_slice %324 {offsets = [0, 64], sizes = [8, 32], strides = [1, 1]} : vector<8x96xf32> to vector<8x32xf32>
    %330 = arith.mulf %328, %311 : vector<8x32xf32>
    %331 = arith.mulf %327, %326 : vector<8x32xf32>
    %332 = arith.addf %330, %331 : vector<8x32xf32>
    %333 = math.tanh %332 : vector<8x32xf32>
    %334 = arith.mulf %329, %333 : vector<8x32xf32>
    %c5_116 = arith.constant 5 : index
    %c0_117 = arith.constant 0 : index
    %c0_118 = arith.constant 0 : index
    %335 = vector.load %arg14[%c5_116, %c0_117, %c0_118] : memref<8x8x128xf32, #tpu.memory_space<vmem>>, vector<1x8x128xf32>
    %336 = vector.shape_cast %335 : vector<1x8x128xf32> to vector<8x128xf32>
    %337 = arith.truncf %334 : vector<8x32xf32> to vector<8x32xbf16>
    %cst_119 = arith.constant dense<0.000000e+00> : vector<8x128xf32>
    %338 = tpu.matmul %337, %219, %cst_119 {dimension_numbers = #tpu.dot_dimension_numbers<[1], [0], [0], [1], [0, 0, 1, 1], [], []>} : vector<8x32xbf16>, vector<32x128xbf16>, vector<8x128xf32> -> vector<8x128xf32>
    %339 = arith.addf %336, %338 : vector<8x128xf32>
    %340 = vector.extract_strided_slice %339 {offsets = [0, 0], sizes = [8, 96], strides = [1, 1]} : vector<8x128xf32> to vector<8x96xf32>
    %341 = arith.negf %340 : vector<8x96xf32>
    %342 = math.exp %341 : vector<8x96xf32>
    %cst_120 = arith.constant 1.000000e+00 : f32
    %343 = vector.broadcast %cst_120 : f32 to vector<8x96xf32>
    %344 = arith.addf %343, %342 : vector<8x96xf32>
    %345 = arith.divf %343, %344 : vector<8x96xf32>
    %346 = vector.extract_strided_slice %339 {offsets = [0, 96], sizes = [8, 32], strides = [1, 1]} : vector<8x128xf32> to vector<8x32xf32>
    %347 = math.tanh %346 : vector<8x32xf32>
    %348 = vector.extract_strided_slice %345 {offsets = [0, 0], sizes = [8, 32], strides = [1, 1]} : vector<8x96xf32> to vector<8x32xf32>
    %349 = vector.extract_strided_slice %345 {offsets = [0, 32], sizes = [8, 32], strides = [1, 1]} : vector<8x96xf32> to vector<8x32xf32>
    %350 = vector.extract_strided_slice %345 {offsets = [0, 64], sizes = [8, 32], strides = [1, 1]} : vector<8x96xf32> to vector<8x32xf32>
    %351 = arith.mulf %349, %332 : vector<8x32xf32>
    %352 = arith.mulf %348, %347 : vector<8x32xf32>
    %353 = arith.addf %351, %352 : vector<8x32xf32>
    %354 = math.tanh %353 : vector<8x32xf32>
    %355 = arith.mulf %350, %354 : vector<8x32xf32>
    %c6_121 = arith.constant 6 : index
    %c0_122 = arith.constant 0 : index
    %c0_123 = arith.constant 0 : index
    %356 = vector.load %arg14[%c6_121, %c0_122, %c0_123] : memref<8x8x128xf32, #tpu.memory_space<vmem>>, vector<1x8x128xf32>
    %357 = vector.shape_cast %356 : vector<1x8x128xf32> to vector<8x128xf32>
    %358 = arith.truncf %355 : vector<8x32xf32> to vector<8x32xbf16>
    %cst_124 = arith.constant dense<0.000000e+00> : vector<8x128xf32>
    %359 = tpu.matmul %358, %219, %cst_124 {dimension_numbers = #tpu.dot_dimension_numbers<[1], [0], [0], [1], [0, 0, 1, 1], [], []>} : vector<8x32xbf16>, vector<32x128xbf16>, vector<8x128xf32> -> vector<8x128xf32>
    %360 = arith.addf %357, %359 : vector<8x128xf32>
    %361 = vector.extract_strided_slice %360 {offsets = [0, 0], sizes = [8, 96], strides = [1, 1]} : vector<8x128xf32> to vector<8x96xf32>
    %362 = arith.negf %361 : vector<8x96xf32>
    %363 = math.exp %362 : vector<8x96xf32>
    %cst_125 = arith.constant 1.000000e+00 : f32
    %364 = vector.broadcast %cst_125 : f32 to vector<8x96xf32>
    %365 = arith.addf %364, %363 : vector<8x96xf32>
    %366 = arith.divf %364, %365 : vector<8x96xf32>
    %367 = vector.extract_strided_slice %360 {offsets = [0, 96], sizes = [8, 32], strides = [1, 1]} : vector<8x128xf32> to vector<8x32xf32>
    %368 = math.tanh %367 : vector<8x32xf32>
    %369 = vector.extract_strided_slice %366 {offsets = [0, 0], sizes = [8, 32], strides = [1, 1]} : vector<8x96xf32> to vector<8x32xf32>
    %370 = vector.extract_strided_slice %366 {offsets = [0, 32], sizes = [8, 32], strides = [1, 1]} : vector<8x96xf32> to vector<8x32xf32>
    %371 = vector.extract_strided_slice %366 {offsets = [0, 64], sizes = [8, 32], strides = [1, 1]} : vector<8x96xf32> to vector<8x32xf32>
    %372 = arith.mulf %370, %353 : vector<8x32xf32>
    %373 = arith.mulf %369, %368 : vector<8x32xf32>
    %374 = arith.addf %372, %373 : vector<8x32xf32>
    %375 = math.tanh %374 : vector<8x32xf32>
    %376 = arith.mulf %371, %375 : vector<8x32xf32>
    %c7_126 = arith.constant 7 : index
    %c0_127 = arith.constant 0 : index
    %c0_128 = arith.constant 0 : index
    %377 = vector.load %arg14[%c7_126, %c0_127, %c0_128] : memref<8x8x128xf32, #tpu.memory_space<vmem>>, vector<1x8x128xf32>
    %378 = vector.shape_cast %377 : vector<1x8x128xf32> to vector<8x128xf32>
    %379 = arith.truncf %376 : vector<8x32xf32> to vector<8x32xbf16>
    %cst_129 = arith.constant dense<0.000000e+00> : vector<8x128xf32>
    %380 = tpu.matmul %379, %219, %cst_129 {dimension_numbers = #tpu.dot_dimension_numbers<[1], [0], [0], [1], [0, 0, 1, 1], [], []>} : vector<8x32xbf16>, vector<32x128xbf16>, vector<8x128xf32> -> vector<8x128xf32>
    %381 = arith.addf %378, %380 : vector<8x128xf32>
    %382 = vector.extract_strided_slice %381 {offsets = [0, 0], sizes = [8, 96], strides = [1, 1]} : vector<8x128xf32> to vector<8x96xf32>
    %383 = arith.negf %382 : vector<8x96xf32>
    %384 = math.exp %383 : vector<8x96xf32>
    %cst_130 = arith.constant 1.000000e+00 : f32
    %385 = vector.broadcast %cst_130 : f32 to vector<8x96xf32>
    %386 = arith.addf %385, %384 : vector<8x96xf32>
    %387 = arith.divf %385, %386 : vector<8x96xf32>
    %388 = vector.extract_strided_slice %381 {offsets = [0, 96], sizes = [8, 32], strides = [1, 1]} : vector<8x128xf32> to vector<8x32xf32>
    %389 = math.tanh %388 : vector<8x32xf32>
    %390 = vector.extract_strided_slice %387 {offsets = [0, 0], sizes = [8, 32], strides = [1, 1]} : vector<8x96xf32> to vector<8x32xf32>
    %391 = vector.extract_strided_slice %387 {offsets = [0, 32], sizes = [8, 32], strides = [1, 1]} : vector<8x96xf32> to vector<8x32xf32>
    %392 = vector.extract_strided_slice %387 {offsets = [0, 64], sizes = [8, 32], strides = [1, 1]} : vector<8x96xf32> to vector<8x32xf32>
    %393 = arith.mulf %391, %374 : vector<8x32xf32>
    %394 = arith.mulf %390, %389 : vector<8x32xf32>
    %395 = arith.addf %393, %394 : vector<8x32xf32>
    %396 = math.tanh %395 : vector<8x32xf32>
    %397 = arith.mulf %392, %396 : vector<8x32xf32>
    %c1_131 = arith.constant 1 : index
    %c0_132 = arith.constant 0 : index
    %c0_133 = arith.constant 0 : index
    %398 = vector.load %arg11[%c1_131, %c0_132, %c0_133] : memref<2x8x32xf32, #tpu.memory_space<vmem>>, vector<1x8x32xf32>
    %399 = vector.shape_cast %398 : vector<1x8x32xf32> to vector<8x32xf32>
    %400 = vector.shape_cast %397 : vector<8x32xf32> to vector<1x8x32xf32>
    tpu.vector_store %arg11[%c1_131, %c0_132, %c0_133], %400 {strides = array<i32>} : memref<2x8x32xf32, #tpu.memory_space<vmem>>, vector<1x8x32xf32>,
    %c1_134 = arith.constant 1 : index
    %c0_135 = arith.constant 0 : index
    %c0_136 = arith.constant 0 : index
    %401 = vector.load %arg12[%c1_134, %c0_135, %c0_136] : memref<2x8x32xf32, #tpu.memory_space<vmem>>, vector<1x8x32xf32>
    %402 = vector.shape_cast %401 : vector<1x8x32xf32> to vector<8x32xf32>
    %403 = vector.shape_cast %395 : vector<8x32xf32> to vector<1x8x32xf32>
    tpu.vector_store %arg12[%c1_134, %c0_135, %c0_136], %403 {strides = array<i32>} : memref<2x8x32xf32, #tpu.memory_space<vmem>>, vector<1x8x32xf32>,
    %404 = arith.truncf %397 : vector<8x32xf32> to vector<8x32xbf16>
    %c0_137 = arith.constant 0 : index
    %c0_138 = arith.constant 0 : index
    %405 = vector.load %arg8[%c0_137, %c0_138] : memref<32x1xbf16, #tpu.memory_space<vmem>>, vector<32x1xbf16>
    %cst_139 = arith.constant dense<0.000000e+00> : vector<8x1xf32>
    %406 = tpu.matmul %404, %405, %cst_139 {dimension_numbers = #tpu.dot_dimension_numbers<[1], [0], [0], [1], [0, 0, 1, 1], [], []>} : vector<8x32xbf16>, vector<32x1xbf16>, vector<8x1xf32> -> vector<8x1xf32>
    %c0_140 = arith.constant 0 : index
    %c0_141 = arith.constant 0 : index
    %407 = vector.load %arg9[%c0_140, %c0_141] : memref<1x1xf32, #tpu.memory_space<vmem>>, vector<1x1xf32>
    %408 = vector.broadcast %407 : vector<1x1xf32> to vector<8x1xf32>
    %409 = arith.addf %406, %408 : vector<8x1xf32>
    %410 = arith.negf %409 : vector<8x1xf32>
    %411 = math.exp %410 : vector<8x1xf32>
    %cst_142 = arith.constant 1.000000e+00 : f32
    %412 = vector.broadcast %cst_142 : f32 to vector<8x1xf32>
    %413 = arith.addf %412, %411 : vector<8x1xf32>
    %414 = arith.divf %412, %413 : vector<8x1xf32>
    %c0_143 = arith.constant 0 : index
    %c0_144 = arith.constant 0 : index
    %415 = vector.load %arg10[%c0_143, %c0_144] : memref<8x1xf32, #tpu.memory_space<vmem>>, vector<8x1xf32>
    tpu.vector_store %arg10[%c0_143, %c0_144], %414 {strides = array<i32>} : memref<8x1xf32, #tpu.memory_space<vmem>>, vector<8x1xf32>,
    return
  }
  func.func @transform_0(%arg0: i32) -> (i32, i32, i32) {
    %c0_i32 = arith.constant 0 : i32
    %c0_i32_0 = arith.constant 0 : i32
    %c0_i32_1 = arith.constant 0 : i32
    %c0_i32_2 = arith.constant 0 : i32
    return %c0_i32, %c0_i32_0, %c0_i32_1 : i32, i32, i32
  }
  func.func @transform_1(%arg0: i32) -> (i32, i32) {
    %c0_i32 = arith.constant 0 : i32
    %c0_i32_0 = arith.constant 0 : i32
    %c0_i32_1 = arith.constant 0 : i32
    return %c0_i32, %c0_i32_0 : i32, i32
  }
  func.func @transform_2(%arg0: i32) -> (i32, i32) {
    %c0_i32 = arith.constant 0 : i32
    %c0_i32_0 = arith.constant 0 : i32
    %c0_i32_1 = arith.constant 0 : i32
    return %c0_i32, %c0_i32_0 : i32, i32
  }
  func.func @transform_3(%arg0: i32) -> (i32, i32) {
    %c0_i32 = arith.constant 0 : i32
    %c0_i32_0 = arith.constant 0 : i32
    %c0_i32_1 = arith.constant 0 : i32
    return %c0_i32, %c0_i32_0 : i32, i32
  }
  func.func @transform_4(%arg0: i32) -> (i32, i32) {
    %c0_i32 = arith.constant 0 : i32
    %c0_i32_0 = arith.constant 0 : i32
    %c0_i32_1 = arith.constant 0 : i32
    return %c0_i32, %c0_i32_0 : i32, i32
  }
  func.func @transform_5(%arg0: i32) -> (i32, i32) {
    %c0_i32 = arith.constant 0 : i32
    %c0_i32_0 = arith.constant 0 : i32
    %c0_i32_1 = arith.constant 0 : i32
    return %c0_i32, %c0_i32_0 : i32, i32
  }
  func.func @transform_6(%arg0: i32) -> (i32, i32) {
    %c0_i32 = arith.constant 0 : i32
    %c0_i32_0 = arith.constant 0 : i32
    %c0_i32_1 = arith.constant 0 : i32
    return %c0_i32, %c0_i32_0 : i32, i32
  }
  func.func @transform_7(%arg0: i32) -> (i32, i32) {
    %c0_i32 = arith.constant 0 : i32
    %c0_i32_0 = arith.constant 0 : i32
    %c0_i32_1 = arith.constant 0 : i32
    return %c0_i32, %c0_i32_0 : i32, i32
  }
  func.func @transform_8(%arg0: i32) -> (i32, i32) {
    %c0_i32 = arith.constant 0 : i32
    %c0_i32_0 = arith.constant 0 : i32
    %c0_i32_1 = arith.constant 0 : i32
    return %c0_i32, %c0_i32_0 : i32, i32
  }
  func.func @transform_9(%arg0: i32) -> (i32, i32) {
    %c0_i32 = arith.constant 0 : i32
    %c0_i32_0 = arith.constant 0 : i32
    %c0_i32_1 = arith.constant 0 : i32
    return %c0_i32, %c0_i32_0 : i32, i32
  }
  func.func @transform_10(%arg0: i32) -> (i32, i32, i32) {
    %c0_i32 = arith.constant 0 : i32
    %c0_i32_0 = arith.constant 0 : i32
    %c0_i32_1 = arith.constant 0 : i32
    %c0_i32_2 = arith.constant 0 : i32
    return %c0_i32, %c0_i32_0, %c0_i32_1 : i32, i32, i32
  }
  func.func @transform_11(%arg0: i32) -> (i32, i32, i32) {
    %c0_i32 = arith.constant 0 : i32
    %c0_i32_0 = arith.constant 0 : i32
    %c0_i32_1 = arith.constant 0 : i32
    %c0_i32_2 = arith.constant 0 : i32
    return %c0_i32, %c0_i32_0, %c0_i32_1 : i32, i32, i32
  }
}

</mosaic_0001>

<bundles_post_ra>
// kernel: lstm_forward.1
= control target key start
LH: loop header
LB: loop body
LE: loop exit
PB: predicated region body
PF: predicated region fallthrough
CT: control target
= control target key end

     0   :  { %s2067_s0 = inlined_call_operand.vmem [shape: bf16[8,8,32], index: 0, kind: input, shape index: {}]   ;;  %s2068_s1 = inlined_call_operand.vmem [shape: bf16[32,128], index: 1, kind: input, shape index: {}]   ;;  %s2069_s2 = inlined_call_operand.vmem [shape: bf16[32,128], index: 2, kind: input, shape index: {}]   ;;  %s2070_s3 = inlined_call_operand.vmem [shape: f32[1,128], index: 3, kind: input, shape index: {}]   ;;  %s2071_s4 = inlined_call_operand.vmem [shape: bf16[32,128], index: 4, kind: input, shape index: {}]   ;;  %s2072_s5 = inlined_call_operand.vmem [shape: bf16[32,128], index: 5, kind: input, shape index: {}]   ;;  %s2073_s6 = inlined_call_operand.vmem [shape: f32[1,128], index: 6, kind: input, shape index: {}]   ;;  %s2074_s7 = inlined_call_operand.vmem [shape: bf16[32,1], index: 7, kind: input, shape index: {}]   ;;  %s2075_s8 = inlined_call_operand.<no memory space> [shape: f32[1,1], index: 8, kind: input, shape index: {}]   ;;  %s2076_s9 = inlined_call_operand.vmem [shape: f32[8,1], index: 9, kind: output, shape index: {0}]   ;;  %s2077_s10 = inlined_call_operand.hbm [shape: f32[2,8,32], index: 10, kind: output, shape index: {1}]   ;;  %s2078_s11 = inlined_call_operand.hbm [shape: f32[2,8,32], index: 11, kind: output, shape index: {2}]  }
   0x1   :  { %v17_v0 = vstv %s2075_s8 }
   0x2   :  { %18 = vst [vmem:[#allocation4] sm:$0x1] %v17_v0 }
   0x3   :  { %19 = vsyncpa [#allocation6], 0  ;;  %v1499_v1 = vld [vmem:[%s2068_s1 + $0x8] sm:$0xff]  ;;  %v1498_v3 = vld [vmem:[%s2068_s1] sm:$0xff] }
   0x4   :  { %v1789_v2 = vld [vmem:[%s2069_s2 + $0x8] sm:$0xff]  ;;  %111 = vmatpush.bf16.msra.mxu0 %v1499_v1  ;;  %v1798_v4 = vld [vmem:[%s2069_s2] sm:$0xff] }
   0x5   :  { %164 = vmatpush.bf16.msra.mxu1 %v1789_v2  ;;  %231 = vmatpush.bf16.msra.mxu2 %v1789_v2 }
   0x6   :  { %298 = vmatpush.bf16.msra.mxu3 %v1789_v2 }
   0x7   :  { %20 = vsyncpa [#allocation8], 0  ;;  %v1502_v5 = vld [vmem:[%s2067_s0] sm:$0xff]  ;;  %vm92_vm0 = vcmask 261120   ;;  %v1712_v6 = vmov 0   ;;  %s1713_s28 = smov 32  }
   0x8   :  { %112 = vmatpush.bf16.msra.mxu0 %v1498_v3  ;;  %v1821_v7 = vld [vmem:[%s2070_s3] ss:$0 sm:$0xff]  ;;  %s1714_s29 = smov 64   ;;  %v1503_v0 = vld [vmem:[%s2067_s0 + $0x8] sm:$0xff]  ;;  %s1716_s1 = smov [#allocation5]  }
   0x9   :  { %165 = vmatpush.bf16.msra.mxu1 %v1798_v4  ;;  %232 = vmatpush.bf16.msra.mxu2 %v1798_v4  ;;  %s1352_s2 = sshll.u32 %s1716_s1, 4  ;;  %s1354_s30 = sshll.u32 %s2077_s10, 4  ;;  %s1353_s2 = int_to_ptr.vmem [resolvable:$true] %s1352_s2  ;;  %s1355_s30 = int_to_ptr.hbm [resolvable:$true] %s1354_s30 }
   0xa   :  { %299 = vmatpush.bf16.msra.mxu3 %v1798_v4  ;;  %s1717_s12 = smov 128   ;;  %s1718_s13 = smov 8  }
   0xb   :  { %1410 = vmatmul.msk.bf16.vlgmr.msra.gmra.mxu0 %vm92_vm0, %v1502_v5  ;;  %s1719_s14 = smov [#allocation7]   ;;  %s1367_s17 = sshll.u32 %s2078_s11, 4  ;;  %s1368_s17 = int_to_ptr.hbm [resolvable:$true] %s1367_s17 }
   0xc   :  { %166 = vmatmul.bf16.vlgmr.msra.gmra.mxu1 %v1712_v6  ;;  %s1365_s15 = sshll.u32 %s1719_s14, 4  ;;  %s1366_s15 = int_to_ptr.vmem [resolvable:$true] %s1365_s15 }
   0xd   :  { %365 = vmatpush.bf16.msrb.mxu1 %v1789_v2  ;;  %432 = vmatpush.bf16.msrb.mxu2 %v1789_v2 }
   0xe   :  { %499 = vmatpush.bf16.msrb.mxu3 %v1789_v2 }
  0x11   :  { %366 = vmatpush.bf16.msrb.mxu1 %v1798_v4  ;;  %433 = vmatpush.bf16.msrb.mxu2 %v1798_v4 }
  0x12   :  { %500 = vmatpush.bf16.msrb.mxu3 %v1798_v4 }
  0x15   :  { %566 = vmatpush.bf16.msra.mxu1 %v1789_v2 }
  0x19   :  { %567 = vmatpush.bf16.msra.mxu1 %v1798_v4 }
  0x1b   :  { %1411 = vmatmul.msk.bf16.gmra.mxu0 %vm92_vm0, %v1503_v0 }
  0x88   :  { %v114_v8 = vpop.f32.mrf.mxu0 }
  0x89   :  { %v167_v9 = vpop.f32.mrf.mxu1  ;;  %v115_v10 = vadd.f32 %v1821_v7, %v114_v8 }
  0x8b   :  { %v171_v11 = vadd.f32 %v167_v9, %v115_v10 }
  0x8d   :  { %1527 = vtanh.f32 %v171_v11  ;;  %v1422_v14 = vmul.f32 -1.442695, %v171_v11 }
  0x8f   :  { %1529 = vpow2.f32 %v1422_v14 }
  0x90   :  { %v116_v39 = vpop.f32.mrf.mxu0 }
  0x91   :  { %v169_v12 = vpop.f32.mrf.mxu1  ;;  %v117_v40 = vadd.f32 %v1821_v7, %v116_v39 }
  0x93   :  { %v1528_v13 = vpop.eup %1527 }
  0x94   :  { %194 = vrot.lane.b32.xlu0 %v1528_v13, %s1713_s28 }
  0x95   :  { %v1530_v15 = vpop.eup %1529 }
  0x96   :  { %v175_v16 = vadd.f32 1.0, %v1530_v15 }
  0x98   :  { %1531 = vrcp.f32 %v175_v16  ;;  %v187_v22 = vand.u32 2147483648, %v175_v16  ;;  %vm181_vm2 = vweird.f32 %v175_v16  ;;  %v185_v23 = vand.u32 2147483647, %v175_v16  ;;  %v119_v9 = vpop.f32.mrf.mxu0 }
  0x99   :  { %v120_v10 = vadd.f32 %v1821_v7, %v119_v9 }
  0x9a   :  { %v188_v25 = vor.u32 1.1754944e-38, %v187_v22  ;;  %vm186_vm4 = vcmp.eq.f32.partialorder %v185_v23, 8.507059e+37 }
  0x9e   :  { %v1532_v17 = vpop.eup %1531 }
  0x9f   :  { %v177_v18 = vmul.f32 %v1532_v17, %v175_v16  ;;  %vm182_vm1 = vweird.f32 %v1532_v17 }
  0xa0   :  { %vm183_vm3 = vmor %vm181_vm2, %vm182_vm1 }
  0xa1   :  { %v178_v19 = vsub.f32 1.0, %v177_v18 }
  0xa3   :  { %v179_v20 = vmul.f32 %v1532_v17, %v178_v19 }
  0xa5   :  { %v180_v21 = vadd.f32 %v1532_v17, %v179_v20 }
  0xa7   :  { %v184_v24 = vsel %vm183_vm3, %v1532_v17, %v180_v21 }
  0xa8   :  { %v189_v27 = vsel %vm186_vm4, %v188_v25, %v184_v24 }
  0xa9   :  { %v192_v29 = vmul.f32 0.0, %v189_v27 }
 0x106   :  { %v195_v26 = vpop.permute.xlu0 %194 }
 0x107   :  { %v197_v28 = vmul.f32 %v195_v26, %v189_v27 }
 0x109   :  { %199 = vrot.lane.b32.xlu0 %v197_v28, %s1713_s28 }
 0x17b   :  { %v200_v30 = vpop.permute.xlu0 %199 }
 0x17c   :  { %v202_v31 = vadd.f32 %v200_v30, %v192_v29 }
 0x17e   :  { %1533 = vtanh.f32 %v202_v31 }
 0x184   :  { %v1534_v32 = vpop.eup %1533 }
 0x185   :  { %205 = vrot.lane.b32.xlu1 %v1534_v32, %s1713_s28 }
 0x1f7   :  { %v206_v33 = vpop.permute.xlu1 %205 }
 0x1f8   :  { %v208_v34 = vmul.f32 %v206_v33, %v189_v27 }
 0x1fa   :  { %v1827_v35 = vpack.c.bf16 %v208_v34, %v208_v34 }
 0x1fc   :  { %v218_v36 = vunpack.c.l.b16 %v1827_v35 }
 0x1fe   :  { %v219_v37 = vpack.c.b16 %v218_v36, %v218_v36 }
 0x200   :  { %220 = vrot.lane.b32.xlu1 %v219_v37, %s1714_s29 }
 0x272   :  { %v221_v38 = vpop.permute.xlu1 %220 }
 0x273   :  { %1423 = vmatmul.msk.bf16.vlgmr.msra.gmra.mxu2 %vm92_vm0, %v221_v38 }
 0x274   :  { %633 = vmatpush.bf16.msra.mxu2 %v1789_v2 }
 0x278   :  { %634 = vmatpush.bf16.msra.mxu2 %v1798_v4 }
 0x2f6   :  { %v234_v41 = vpop.f32.mrf.mxu2 }
 0x2f7   :  { %v238_v42 = vadd.f32 %v234_v41, %v117_v40  ;;  %v121_v41 = vpop.f32.mrf.mxu0 }
 0x2f9   :  { %1535 = vtanh.f32 %v238_v42  ;;  %v1424_v45 = vmul.f32 -1.442695, %v238_v42  ;;  %v122_v42 = vadd.f32 %v1821_v7, %v121_v41 }
 0x2fb   :  { %1537 = vpow2.f32 %v1424_v45 }
 0x2fe   :  { %v236_v43 = vpop.f32.mrf.mxu2 }
 0x2ff   :  { %v1536_v44 = vpop.eup %1535 }
 0x300   :  { %261 = vrot.lane.b32.xlu2 %v1536_v44, %s1713_s28 }
 0x301   :  { %v1538_v46 = vpop.eup %1537 }
 0x302   :  { %v242_v47 = vadd.f32 1.0, %v1538_v46 }
 0x304   :  { %1539 = vrcp.f32 %v242_v47  ;;  %v254_v53 = vand.u32 2147483648, %v242_v47  ;;  %vm248_vm6 = vweird.f32 %v242_v47  ;;  %v252_v54 = vand.u32 2147483647, %v242_v47 }
 0x306   :  { %v255_v56 = vor.u32 1.1754944e-38, %v254_v53  ;;  %vm253_vm8 = vcmp.eq.f32.partialorder %v252_v54, 8.507059e+37 }
 0x30a   :  { %v1540_v48 = vpop.eup %1539 }
 0x30b   :  { %v244_v49 = vmul.f32 %v1540_v48, %v242_v47  ;;  %vm249_vm5 = vweird.f32 %v1540_v48 }
 0x30c   :  { %vm250_vm7 = vmor %vm248_vm6, %vm249_vm5 }
 0x30d   :  { %v245_v50 = vsub.f32 1.0, %v244_v49 }
 0x30f   :  { %v246_v51 = vmul.f32 %v1540_v48, %v245_v50 }
 0x311   :  { %v247_v52 = vadd.f32 %v1540_v48, %v246_v51 }
 0x313   :  { %v251_v55 = vsel %vm250_vm7, %v1540_v48, %v247_v52 }
 0x314   :  { %v256_v58 = vsel %vm253_vm8, %v255_v56, %v251_v55 }
 0x315   :  { %v259_v60 = vmul.f32 %v256_v58, %v202_v31 }
 0x35a   :  { %v262_v57 = vpop.permute.xlu2 %261 }
 0x35b   :  { %v264_v59 = vmul.f32 %v262_v57, %v256_v58 }
 0x35d   :  { %266 = vrot.lane.b32.xlu2 %v264_v59, %s1713_s28 }
 0x3b7   :  { %v267_v61 = vpop.permute.xlu2 %266 }
 0x3b8   :  { %v269_v62 = vadd.f32 %v267_v61, %v259_v60 }
 0x3ba   :  { %1541 = vtanh.f32 %v269_v62 }
 0x3c0   :  { %v1542_v63 = vpop.eup %1541 }
 0x3c1   :  { %272 = vrot.lane.b32.xlu0 %v1542_v63, %s1713_s28 }
 0x433   :  { %v273_v1 = vpop.permute.xlu0 %272 }
 0x434   :  { %v275_v2 = vmul.f32 %v273_v1, %v256_v58 }
 0x436   :  { %v1842_v3 = vpack.c.bf16 %v275_v2, %v275_v2  ;;  %v1504_v2 = vld [vmem:[%s2067_s0 + $0x10] sm:$0xff] }
 0x437   :  { %1412 = vmatmul.msk.bf16.gmra.mxu0 %vm92_vm0, %v1504_v2 }
 0x438   :  { %v285_v4 = vunpack.c.l.b16 %v1842_v3 }
 0x43a   :  { %v286_v5 = vpack.c.b16 %v285_v4, %v285_v4 }
 0x43c   :  { %287 = vrot.lane.b32.xlu1 %v286_v5, %s1714_s29 }
 0x4ae   :  { %v288_v8 = vpop.permute.xlu1 %287 }
 0x4af   :  { %1425 = vmatmul.msk.bf16.vlgmr.msra.gmra.mxu3 %vm92_vm0, %v288_v8 }
 0x532   :  { %v301_v11 = vpop.f32.mrf.mxu3 }
 0x533   :  { %v305_v12 = vadd.f32 %v301_v11, %v120_v10 }
 0x535   :  { %1543 = vtanh.f32 %v305_v12  ;;  %v1426_v15 = vmul.f32 -1.442695, %v305_v12  ;;  %v124_v12 = vpop.f32.mrf.mxu0 }
 0x537   :  { %1545 = vpow2.f32 %v1426_v15 }
 0x53a   :  { %v303_v13 = vpop.f32.mrf.mxu3 }
 0x53b   :  { %v1544_v14 = vpop.eup %1543  ;;  %v125_v13 = vadd.f32 %v1821_v7, %v124_v12  ;;  %v1505_v12 = vld [vmem:[%s2067_s0 + $0x18] sm:$0xff] }
 0x53c   :  { %328 = vrot.lane.b32.xlu2 %v1544_v14, %s1713_s28  ;;  %1413 = vmatmul.msk.bf16.gmra.mxu0 %vm92_vm0, %v1505_v12 }
 0x53d   :  { %v1546_v16 = vpop.eup %1545 }
 0x53e   :  { %v309_v17 = vadd.f32 1.0, %v1546_v16 }
 0x540   :  { %1547 = vrcp.f32 %v309_v17  ;;  %v321_v23 = vand.u32 2147483648, %v309_v17  ;;  %vm315_vm10 = vweird.f32 %v309_v17  ;;  %v319_v24 = vand.u32 2147483647, %v309_v17 }
 0x542   :  { %v322_v26 = vor.u32 1.1754944e-38, %v321_v23  ;;  %vm320_vm12 = vcmp.eq.f32.partialorder %v319_v24, 8.507059e+37 }
 0x546   :  { %v1548_v18 = vpop.eup %1547 }
 0x547   :  { %v311_v19 = vmul.f32 %v1548_v18, %v309_v17  ;;  %vm316_vm9 = vweird.f32 %v1548_v18 }
 0x548   :  { %vm317_vm11 = vmor %vm315_vm10, %vm316_vm9  ;;  %vm214_vm10 = vcmask 257024  }
 0x549   :  { %v312_v20 = vsub.f32 1.0, %v311_v19 }
 0x54b   :  { %v313_v21 = vmul.f32 %v1548_v18, %v312_v20 }
 0x54d   :  { %v314_v22 = vadd.f32 %v1548_v18, %v313_v21 }
 0x54f   :  { %v318_v25 = vsel %vm317_vm11, %v1548_v18, %v314_v22 }
 0x550   :  { %v323_v28 = vsel %vm320_vm12, %v322_v26, %v318_v25 }
 0x551   :  { %v326_v30 = vmul.f32 %v323_v28, %v269_v62 }
 0x596   :  { %v329_v27 = vpop.permute.xlu2 %328 }
 0x597   :  { %v331_v29 = vmul.f32 %v329_v27, %v323_v28 }
 0x599   :  { %333 = vrot.lane.b32.xlu0 %v331_v29, %s1713_s28 }
 0x60b   :  { %v334_v31 = vpop.permute.xlu0 %333 }
 0x60c   :  { %v336_v32 = vadd.f32 %v334_v31, %v326_v30 }
 0x60e   :  { %1549 = vtanh.f32 %v336_v32 }
 0x614   :  { %v1550_v33 = vpop.eup %1549 }
 0x615   :  { %339 = vrot.lane.b32.xlu1 %v1550_v33, %s1713_s28 }
 0x687   :  { %v340_v34 = vpop.permute.xlu1 %339 }
 0x688   :  { %v342_v36 = vmul.f32 %v340_v34, %v323_v28 }
 0x68a   :  { %v1851_v37 = vpack.c.bf16 %v342_v36, %v342_v36 }
 0x68c   :  { %v352_v38 = vunpack.c.l.b16 %v1851_v37 }
 0x68e   :  { %v353_v39 = vpack.c.b16 %v352_v38, %v352_v38 }
 0x690   :  { %354 = vrot.lane.b32.xlu2 %v353_v39, %s1714_s29 }
 0x6ea   :  { %v355_v40 = vpop.permute.xlu2 %354 }
 0x6eb   :  { %1427 = vmatmul.msk.bf16.vlgmr.msrb.gmra.mxu1 %vm92_vm0, %v355_v40 }
 0x768   :  { %v368_v43 = vpop.f32.mrf.mxu1 }
 0x769   :  { %v372_v44 = vadd.f32 %v368_v43, %v122_v42 }
 0x76b   :  { %1551 = vtanh.f32 %v372_v44  ;;  %v1428_v47 = vmul.f32 -1.442695, %v372_v44 }
 0x76d   :  { %1553 = vpow2.f32 %v1428_v47 }
 0x770   :  { %v370_v45 = vpop.f32.mrf.mxu1 }
 0x771   :  { %v1552_v46 = vpop.eup %1551  ;;  %v126_v45 = vpop.f32.mrf.mxu0 }
 0x772   :  { %395 = vrot.lane.b32.xlu0 %v1552_v46, %s1713_s28  ;;  %v127_v46 = vadd.f32 %v1821_v7, %v126_v45 }
 0x773   :  { %v1554_v48 = vpop.eup %1553 }
 0x774   :  { %v376_v49 = vadd.f32 1.0, %v1554_v48 }
 0x776   :  { %1555 = vrcp.f32 %v376_v49  ;;  %v388_v55 = vand.u32 2147483648, %v376_v49  ;;  %vm382_vm14 = vweird.f32 %v376_v49  ;;  %v386_v56 = vand.u32 2147483647, %v376_v49 }
 0x778   :  { %v389_v58 = vor.u32 1.1754944e-38, %v388_v55  ;;  %vm387_vm1 = vcmp.eq.f32.partialorder %v386_v56, 8.507059e+37 }
 0x77c   :  { %v1556_v50 = vpop.eup %1555 }
 0x77d   :  { %v378_v51 = vmul.f32 %v1556_v50, %v376_v49  ;;  %vm383_vm13 = vweird.f32 %v1556_v50 }
 0x77e   :  { %vm384_vm15 = vmor %vm382_vm14, %vm383_vm13 }
 0x77f   :  { %v379_v52 = vsub.f32 1.0, %v378_v51 }
 0x781   :  { %v380_v53 = vmul.f32 %v1556_v50, %v379_v52 }
 0x783   :  { %v381_v54 = vadd.f32 %v1556_v50, %v380_v53 }
 0x785   :  { %v385_v57 = vsel %vm384_vm15, %v1556_v50, %v381_v54 }
 0x786   :  { %v390_v60 = vsel %vm387_vm1, %v389_v58, %v385_v57 }
 0x787   :  { %v393_v62 = vmul.f32 %v390_v60, %v336_v32 }
 0x7e4   :  { %v396_v59 = vpop.permute.xlu0 %395 }
 0x7e5   :  { %v398_v61 = vmul.f32 %v396_v59, %v390_v60 }
 0x7e7   :  { %400 = vrot.lane.b32.xlu1 %v398_v61, %s1713_s28 }
 0x859   :  { %v401_v63 = vpop.permute.xlu1 %400 }
 0x85a   :  { %v403_v0 = vadd.f32 %v401_v63, %v393_v62 }
 0x85c   :  { %1557 = vtanh.f32 %v403_v0 }
 0x862   :  { %v1558_v1 = vpop.eup %1557 }
 0x863   :  { %406 = vrot.lane.b32.xlu2 %v1558_v1, %s1713_s28 }
 0x8bd   :  { %v407_v4 = vpop.permute.xlu2 %406 }
 0x8be   :  { %v409_v5 = vmul.f32 %v407_v4, %v390_v60 }
 0x8c0   :  { %v1864_v8 = vpack.c.bf16 %v409_v5, %v409_v5 }
 0x8c2   :  { %v419_v9 = vunpack.c.l.b16 %v1864_v8 }
 0x8c4   :  { %v420_v10 = vpack.c.b16 %v419_v9, %v419_v9 }
 0x8c6   :  { %421 = vrot.lane.b32.xlu0 %v420_v10, %s1714_s29 }
 0x938   :  { %v422_v11 = vpop.permute.xlu0 %421 }
 0x939   :  { %1429 = vmatmul.msk.bf16.vlgmr.msrb.gmra.mxu2 %vm92_vm0, %v422_v11  ;;  %v1506_v11 = vld [vmem:[%s2071_s4] sm:$0xff] }
 0x9bc   :  { %v435_v14 = vpop.f32.mrf.mxu2 }
 0x9bd   :  { %v439_v15 = vadd.f32 %v435_v14, %v125_v13 }
 0x9bf   :  { %1559 = vtanh.f32 %v439_v15  ;;  %v1430_v18 = vmul.f32 -1.442695, %v439_v15 }
 0x9c1   :  { %1561 = vpow2.f32 %v1430_v18 }
 0x9c4   :  { %v437_v16 = vpop.f32.mrf.mxu2 }
 0x9c5   :  { %v1560_v17 = vpop.eup %1559 }
 0x9c6   :  { %462 = vrot.lane.b32.xlu1 %v1560_v17, %s1713_s28 }
 0x9c7   :  { %v1562_v19 = vpop.eup %1561 }
 0x9c8   :  { %v443_v20 = vadd.f32 1.0, %v1562_v19  ;;  %v1909_v19 = vld [vmem:[%s2072_s5 + $0x8] sm:$0xff] }
 0x9c9   :  { %815 = vmatpush.bf16.msrb.mxu1 %v1909_v19  ;;  %874 = vmatpush.bf16.msrb.mxu2 %v1909_v19 }
 0x9ca   :  { %1563 = vrcp.f32 %v443_v20  ;;  %v455_v26 = vand.u32 2147483648, %v443_v20  ;;  %vm449_vm3 = vweird.f32 %v443_v20  ;;  %v453_v27 = vand.u32 2147483647, %v443_v20  ;;  %933 = vmatpush.bf16.msrb.mxu0 %v1909_v19 }
 0x9cc   :  { %v456_v29 = vor.u32 1.1754944e-38, %v455_v26  ;;  %vm454_vm5 = vcmp.eq.f32.partialorder %v453_v27, 8.507059e+37 }
 0x9d0   :  { %v1564_v21 = vpop.eup %1563 }
 0x9d1   :  { %v445_v22 = vmul.f32 %v1564_v21, %v443_v20  ;;  %vm450_vm2 = vweird.f32 %v1564_v21  ;;  %v1915_v20 = vld [vmem:[%s2072_s5] sm:$0xff] }
 0x9d2   :  { %vm451_vm4 = vmor %vm449_vm3, %vm450_vm2  ;;  %816 = vmatpush.bf16.msrb.mxu1 %v1915_v20  ;;  %875 = vmatpush.bf16.msrb.mxu2 %v1915_v20 }
 0x9d3   :  { %v446_v23 = vsub.f32 1.0, %v445_v22  ;;  %934 = vmatpush.bf16.msrb.mxu0 %v1915_v20  ;;  %v129_v22 = vpop.f32.mrf.mxu0 }
 0x9d5   :  { %v447_v24 = vmul.f32 %v1564_v21, %v446_v23  ;;  %v130_v23 = vadd.f32 %v1821_v7, %v129_v22 }
 0x9d7   :  { %v448_v25 = vadd.f32 %v1564_v21, %v447_v24  ;;  %1110 = vmatpush.bf16.msra.mxu0 %v1909_v19 }
 0x9d9   :  { %v452_v28 = vsel %vm451_vm4, %v1564_v21, %v448_v25 }
 0x9da   :  { %v457_v31 = vsel %vm454_vm5, %v456_v29, %v452_v28  ;;  %v1935_v28 = vld [vmem:[%s2073_s6] ss:$0 sm:$0xff] }
 0x9db   :  { %v460_v33 = vmul.f32 %v457_v31, %v403_v0  ;;  %1111 = vmatpush.bf16.msra.mxu0 %v1915_v20 }
 0xa38   :  { %v463_v30 = vpop.permute.xlu1 %462 }
 0xa39   :  { %v465_v32 = vmul.f32 %v463_v30, %v457_v31 }
 0xa3b   :  { %467 = vrot.lane.b32.xlu2 %v465_v32, %s1713_s28 }
 0xa95   :  { %v468_v34 = vpop.permute.xlu2 %467 }
 0xa96   :  { %v470_v36 = vadd.f32 %v468_v34, %v460_v33 }
 0xa98   :  { %1565 = vtanh.f32 %v470_v36 }
 0xa9e   :  { %v1566_v38 = vpop.eup %1565 }
 0xa9f   :  { %473 = vrot.lane.b32.xlu0 %v1566_v38, %s1713_s28 }
 0xb11   :  { %v474_v39 = vpop.permute.xlu0 %473 }
 0xb12   :  { %v476_v40 = vmul.f32 %v474_v39, %v457_v31 }
 0xb14   :  { %v1873_v41 = vpack.c.bf16 %v476_v40, %v476_v40 }
 0xb16   :  { %v486_v42 = vunpack.c.l.b16 %v1873_v41 }
 0xb18   :  { %v487_v43 = vpack.c.b16 %v486_v42, %v486_v42 }
 0xb1a   :  { %488 = vrot.lane.b32.xlu1 %v487_v43, %s1714_s29 }
 0xb8c   :  { %v489_v44 = vpop.permute.xlu1 %488 }
 0xb8d   :  { %1431 = vmatmul.msk.bf16.vlgmr.msrb.gmra.mxu3 %vm92_vm0, %v489_v44 }
 0xc10   :  { %v502_v47 = vpop.f32.mrf.mxu3 }
 0xc11   :  { %v506_v48 = vadd.f32 %v502_v47, %v127_v46 }
 0xc13   :  { %1567 = vtanh.f32 %v506_v48  ;;  %v1432_v51 = vmul.f32 -1.442695, %v506_v48 }
 0xc15   :  { %1569 = vpow2.f32 %v1432_v51 }
 0xc18   :  { %v504_v49 = vpop.f32.mrf.mxu3 }
 0xc19   :  { %v1568_v50 = vpop.eup %1567 }
 0xc1a   :  { %529 = vrot.lane.b32.xlu2 %v1568_v50, %s1713_s28 }
 0xc1b   :  { %v1570_v52 = vpop.eup %1569 }
 0xc1c   :  { %v510_v53 = vadd.f32 1.0, %v1570_v52 }
 0xc1e   :  { %1571 = vrcp.f32 %v510_v53  ;;  %v522_v59 = vand.u32 2147483648, %v510_v53  ;;  %vm516_vm7 = vweird.f32 %v510_v53  ;;  %v520_v60 = vand.u32 2147483647, %v510_v53 }
 0xc20   :  { %v523_v62 = vor.u32 1.1754944e-38, %v522_v59  ;;  %vm521_vm9 = vcmp.eq.f32.partialorder %v520_v60, 8.507059e+37 }
 0xc24   :  { %v1572_v54 = vpop.eup %1571 }
 0xc25   :  { %v512_v55 = vmul.f32 %v1572_v54, %v510_v53  ;;  %vm517_vm6 = vweird.f32 %v1572_v54 }
 0xc26   :  { %vm518_vm8 = vmor %vm516_vm7, %vm517_vm6 }
 0xc27   :  { %v513_v56 = vsub.f32 1.0, %v512_v55 }
 0xc29   :  { %v514_v57 = vmul.f32 %v1572_v54, %v513_v56 }
 0xc2b   :  { %v515_v58 = vadd.f32 %v1572_v54, %v514_v57 }
 0xc2d   :  { %v519_v61 = vsel %vm518_vm8, %v1572_v54, %v515_v58 }
 0xc2e   :  { %v524_v0 = vsel %vm521_vm9, %v523_v62, %v519_v61 }
 0xc2f   :  { %v527_v2 = vmul.f32 %v524_v0, %v470_v36 }
 0xc74   :  { %v530_v63 = vpop.permute.xlu2 %529 }
 0xc75   :  { %v532_v1 = vmul.f32 %v530_v63, %v524_v0 }
 0xc77   :  { %534 = vrot.lane.b32.xlu0 %v532_v1, %s1713_s28 }
 0xc7f   :  { %211 = vrot.lane.b32.xlu0 %v1827_v35, %s1714_s29  ;;  %v1507_v35 = vld [vmem:[%s2071_s4 + $0x8] sm:$0xff] }
 0xc80   :  { %765 = vmatpush.bf16.msra.mxu3 %v1507_v35 }
 0xc84   :  { %766 = vmatpush.bf16.msra.mxu3 %v1506_v11 }
 0xce9   :  { %v535_v4 = vpop.permute.xlu0 %534 }
 0xcea   :  { %v1883_v5 = vadd.f32 %v535_v4, %v527_v2 }
 0xcec   :  { %1573 = vtanh.f32 %v1883_v5 }
 0xcf1   :  { %v212_v9 = vpop.permute.xlu0 %211 }
 0xcf2   :  { %v1574_v10 = vpop.eup %1573  ;;  %215 = vst.msk [vmem:[#allocation2] sm:$0xf] %vm214_vm10, %v212_v9 }
 0xcf3   :  { %540 = vrot.lane.b32.xlu1 %v1574_v10, %s1713_s28 }
 0xcfb   :  { %278 = vrot.lane.b32.xlu1 %v1842_v3, %s1714_s29 }
 0xd65   :  { %v541_v13 = vpop.permute.xlu1 %540 }
 0xd66   :  { %v543_v14 = vmul.f32 %v541_v13, %v524_v0 }
 0xd68   :  { %v1900_v15 = vpack.c.bf16 %v543_v14, %v543_v14 }
 0xd6a   :  { %v553_v3 = vunpack.c.l.b16 %v1900_v15 }
 0xd6c   :  { %v554_v16 = vpack.c.b16 %v553_v3, %v553_v3 }
 0xd6d   :  { %v279_v17 = vpop.permute.xlu1 %278 }
 0xd6e   :  { %282 = vst.msk [vmem:[#allocation2 + $0x4] sm:$0xf] %vm214_vm10, %v279_v17  ;;  %555 = vrot.lane.b32.xlu2 %v554_v16, %s1714_s29 }
 0xd75   :  { %v1510_v18 = vld [vmem:[#allocation2] sm:$0xff] }
 0xd76   :  { %1461 = vmatmul.msk.bf16.vlgmr.msra.gmra.mxu3 %vm92_vm0, %v1510_v18 }
 0xdc8   :  { %v556_v21 = vpop.permute.xlu2 %555 }
 0xdc9   :  { %1433 = vmatmul.msk.bf16.vlgmr.msra.gmra.mxu1 %vm92_vm0, %v556_v21 }
 0xdca   :  { %992 = vmatpush.bf16.msra.mxu1 %v1909_v19 }
 0xdce   :  { %993 = vmatpush.bf16.msra.mxu1 %v1915_v20 }
 0xdd9   :  { %817 = vmatmul.bf16.vlgmr.msrb.gmra.mxu1 %v1712_v6 }
 0xdda   :  { %1169 = vmatpush.bf16.msrb.mxu1 %v1909_v19 }
 0xdde   :  { %1170 = vmatpush.bf16.msrb.mxu1 %v1915_v20 }
 0xdf9   :  { %v768_v6 = vpop.f32.mrf.mxu3 }
 0xdfa   :  { %v769_v29 = vadd.f32 %v1935_v28, %v768_v6 }
 0xe46   :  { %v569_v24 = vpop.f32.mrf.mxu1 }
 0xe47   :  { %v573_v25 = vadd.f32 %v569_v24, %v130_v23 }
 0xe49   :  { %1575 = vtanh.f32 %v573_v25  ;;  %v1434_v33 = vmul.f32 -1.442695, %v573_v25 }
 0xe4e   :  { %v571_v26 = vpop.f32.mrf.mxu1 }
 0xe4f   :  { %v1576_v27 = vpop.eup %1575 }
 0xe50   :  { %596 = vrot.lane.b32.xlu2 %v1576_v27, %s1713_s28  ;;  %v770_v27 = vpop.f32.mrf.mxu3 }
 0xe51   :  { %v771_v6 = vadd.f32 %v1935_v28, %v770_v27 }
 0xe56   :  { %v818_v30 = vpop.f32.mrf.mxu1 }
 0xe57   :  { %v822_v31 = vadd.f32 %v818_v30, %v769_v29 }
 0xe59   :  { %1577 = vtanh.f32 %v822_v31  ;;  %v1473_v45 = vmul.f32 -1.442695, %v822_v31 }
 0xe5a   :  { %1579 = vpow2.f32 %v1434_v33 }
 0xe5e   :  { %v820_v32 = vpop.f32.mrf.mxu1 }
 0xe5f   :  { %v1578_v7 = vpop.eup %1577 }
 0xe60   :  { %845 = vrot.lane.b32.xlu0 %v1578_v7, %s1713_s28  ;;  %v1580_v34 = vpop.eup %1579 }
 0xe61   :  { %v577_v36 = vadd.f32 1.0, %v1580_v34 }
 0xe63   :  { %1581 = vrcp.f32 %v577_v36  ;;  %v589_v44 = vand.u32 2147483648, %v577_v36  ;;  %vm583_vm12 = vweird.f32 %v577_v36  ;;  %v587_v46 = vand.u32 2147483647, %v577_v36 }
 0xe64   :  { %1583 = vpow2.f32 %v1473_v45 }
 0xe65   :  { %v590_v48 = vor.u32 1.1754944e-38, %v589_v44  ;;  %vm588_vm14 = vcmp.eq.f32.partialorder %v587_v46, 8.507059e+37 }
 0xe69   :  { %v1582_v38 = vpop.eup %1581 }
 0xe6a   :  { %v579_v39 = vmul.f32 %v1582_v38, %v577_v36  ;;  %vm584_vm11 = vweird.f32 %v1582_v38  ;;  %v1584_v52 = vpop.eup %1583 }
 0xe6b   :  { %vm585_vm13 = vmor %vm583_vm12, %vm584_vm11  ;;  %v826_v53 = vadd.f32 1.0, %v1584_v52 }
 0xe6c   :  { %v580_v40 = vsub.f32 1.0, %v579_v39 }
 0xe6d   :  { %1585 = vrcp.f32 %v826_v53  ;;  %v838_v59 = vand.u32 2147483648, %v826_v53  ;;  %vm832_vm1 = vweird.f32 %v826_v53  ;;  %v836_v60 = vand.u32 2147483647, %v826_v53 }
 0xe6e   :  { %v581_v42 = vmul.f32 %v1582_v38, %v580_v40 }
 0xe6f   :  { %v839_v62 = vor.u32 1.1754944e-38, %v838_v59  ;;  %vm837_vm3 = vcmp.eq.f32.partialorder %v836_v60, 8.507059e+37 }
 0xe70   :  { %v582_v43 = vadd.f32 %v1582_v38, %v581_v42 }
 0xe72   :  { %v586_v47 = vsel %vm585_vm13, %v1582_v38, %v582_v43 }
 0xe73   :  { %v591_v50 = vsel %vm588_vm14, %v590_v48, %v586_v47  ;;  %v1586_v54 = vpop.eup %1585 }
 0xe74   :  { %v828_v55 = vmul.f32 %v1586_v54, %v826_v53  ;;  %vm833_vm15 = vweird.f32 %v1586_v54  ;;  %v594_v2 = vmul.f32 %v591_v50, %v1883_v5 }
 0xe75   :  { %vm834_vm2 = vmor %vm832_vm1, %vm833_vm15 }
 0xe76   :  { %v829_v56 = vsub.f32 1.0, %v828_v55 }
 0xe78   :  { %v830_v57 = vmul.f32 %v1586_v54, %v829_v56 }
 0xe7a   :  { %v831_v58 = vadd.f32 %v1586_v54, %v830_v57 }
 0xe7c   :  { %v835_v61 = vsel %vm834_vm2, %v1586_v54, %v831_v58 }
 0xe7d   :  { %v840_v0 = vsel %vm837_vm3, %v839_v62, %v835_v61 }
 0xe7e   :  { %v843_v35 = vmul.f32 0.0, %v840_v0 }
 0xeaa   :  { %v597_v49 = vpop.permute.xlu2 %596 }
 0xeab   :  { %v599_v51 = vmul.f32 %v597_v49, %v591_v50 }
 0xead   :  { %601 = vrot.lane.b32.xlu1 %v599_v51, %s1713_s28 }
 0xed2   :  { %v846_v63 = vpop.permute.xlu0 %845 }
 0xed3   :  { %v848_v1 = vmul.f32 %v846_v63, %v840_v0 }
 0xed5   :  { %850 = vrot.lane.b32.xlu2 %v848_v1, %s1713_s28 }
 0xf1f   :  { %v602_v4 = vpop.permute.xlu1 %601 }
 0xf20   :  { %v1942_v9 = vadd.f32 %v602_v4, %v594_v2 }
 0xf22   :  { %1587 = vtanh.f32 %v1942_v9 }
 0xf28   :  { %v1588_v10 = vpop.eup %1587 }
 0xf29   :  { %607 = vrot.lane.b32.xlu0 %v1588_v10, %s1713_s28 }
 0xf2f   :  { %v851_v11 = vpop.permute.xlu2 %850 }
 0xf30   :  { %v853_v12 = vadd.f32 %v851_v11, %v843_v35 }
 0xf32   :  { %1589 = vtanh.f32 %v853_v12 }
 0xf38   :  { %v1590_v13 = vpop.eup %1589 }
 0xf39   :  { %856 = vrot.lane.b32.xlu1 %v1590_v13, %s1713_s28 }
 0xf9b   :  { %v608_v14 = vpop.permute.xlu0 %607 }
 0xf9c   :  { %v610_v3 = vmul.f32 %v608_v14, %v591_v50 }
 0xf9e   :  { %v1947_v16 = vpack.c.bf16 %v610_v3, %v610_v3 }
 0xfa0   :  { %v620_v5 = vunpack.c.l.b16 %v1947_v16 }
 0xfa2   :  { %v621_v17 = vpack.c.b16 %v620_v5, %v620_v5 }
 0xfa4   :  { %622 = vrot.lane.b32.xlu2 %v621_v17, %s1714_s29 }
 0xfab   :  { %v857_v18 = vpop.permute.xlu1 %856 }
 0xfac   :  { %v859_v21 = vmul.f32 %v857_v18, %v840_v0 }
 0xfae   :  { %v861_v22 = vpack.c.bf16 %v859_v21, %v859_v21 }
 0xfb0   :  { %863 = vrot.lane.b32.xlu0 %v861_v22, %s1714_s29 }
 0xffe   :  { %v623_v23 = vpop.permute.xlu2 %622 }
 0xfff   :  { %1435 = vmatmul.msk.bf16.vlgmr.msra.gmra.mxu2 %vm92_vm0, %v623_v23 }
0x1000   :  { %1051 = vmatpush.bf16.msra.mxu2 %v1909_v19 }
0x1004   :  { %1052 = vmatpush.bf16.msra.mxu2 %v1915_v20 }
0x1022   :  { %v864_v24 = vpop.permute.xlu0 %863 }
0x1023   :  { %1474 = vmatmul.msk.bf16.vlgmr.msrb.gmra.mxu2 %vm92_vm0, %v864_v24 }
0x1024   :  { %1228 = vmatpush.bf16.msrb.mxu2 %v1909_v19 }
0x1028   :  { %1229 = vmatpush.bf16.msrb.mxu2 %v1915_v20 }
0x1082   :  { %v1958_v25 = vpop.f32.mrf.mxu2 }
0x108a   :  { %v638_v26 = vpop.f32.mrf.mxu2 }
0x10a6   :  { %v877_v29 = vpop.f32.mrf.mxu2 }
0x10a7   :  { %v881_v30 = vadd.f32 %v877_v29, %v771_v6 }
0x10a9   :  { %1591 = vtanh.f32 %v881_v30  ;;  %v1475_v7 = vmul.f32 -1.442695, %v881_v30 }
0x10ab   :  { %1593 = vpow2.f32 %v1475_v7 }
0x10ae   :  { %v879_v31 = vpop.f32.mrf.mxu2 }
0x10af   :  { %v1592_v32 = vpop.eup %1591 }
0x10b0   :  { %904 = vrot.lane.b32.xlu1 %v1592_v32, %s1713_s28 }
0x10b1   :  { %v1594_v19 = vpop.eup %1593 }
0x10b2   :  { %v885_v20 = vadd.f32 1.0, %v1594_v19 }
0x10b4   :  { %1595 = vrcp.f32 %v885_v20  ;;  %v897_v40 = vand.u32 2147483648, %v885_v20  ;;  %vm891_vm5 = vweird.f32 %v885_v20  ;;  %v895_v42 = vand.u32 2147483647, %v885_v20 }
0x10b6   :  { %v898_v44 = vor.u32 1.1754944e-38, %v897_v40  ;;  %vm896_vm7 = vcmp.eq.f32.partialorder %v895_v42, 8.507059e+37 }
0x10b8   :  { %345 = vrot.lane.b32.xlu1 %v1851_v37, %s1714_s29 }
0x10ba   :  { %v1596_v33 = vpop.eup %1595 }
0x10bb   :  { %v887_v34 = vmul.f32 %v1596_v33, %v885_v20  ;;  %vm892_vm4 = vweird.f32 %v1596_v33 }
0x10bc   :  { %vm893_vm6 = vmor %vm891_vm5, %vm892_vm4 }
0x10bd   :  { %v888_v36 = vsub.f32 1.0, %v887_v34 }
0x10bf   :  { %v889_v38 = vmul.f32 %v1596_v33, %v888_v36 }
0x10c1   :  { %v890_v39 = vadd.f32 %v1596_v33, %v889_v38 }
0x10c3   :  { %v894_v43 = vsel %vm893_vm6, %v1596_v33, %v890_v39 }
0x10c4   :  { %v899_v37 = vsel %vm896_vm7, %v898_v44, %v894_v43 }
0x10c5   :  { %v902_v48 = vmul.f32 %v899_v37, %v853_v12 }
0x1122   :  { %v905_v45 = vpop.permute.xlu1 %904 }
0x1123   :  { %v907_v46 = vmul.f32 %v905_v45, %v899_v37 }
0x1125   :  { %909 = vrot.lane.b32.xlu2 %v907_v46, %s1713_s28 }
0x112a   :  { %v346_v47 = vpop.permute.xlu1 %345 }
0x112b   :  { %349 = vst.msk [vmem:[#allocation2 + $0x8] sm:$0xf] %vm214_vm10, %v346_v47 }
0x112d   :  { %412 = vrot.lane.b32.xlu2 %v1864_v8, %s1714_s29  ;;  %v1973_v8 = vpop.f32.mrf.mxu0 }
0x117f   :  { %v910_v49 = vpop.permute.xlu2 %909 }
0x1180   :  { %v912_v50 = vadd.f32 %v910_v49, %v902_v48 }
0x1182   :  { %1597 = vtanh.f32 %v912_v50 }
0x1187   :  { %v413_v51 = vpop.permute.xlu2 %412 }
0x1188   :  { %v1598_v52 = vpop.eup %1597  ;;  %416 = vst.msk [vmem:[#allocation2 + $0xc] sm:$0xf] %vm214_vm10, %v413_v51 }
0x1189   :  { %915 = vrot.lane.b32.xlu0 %v1598_v52, %s1713_s28 }
0x118f   :  { %v1511_v53 = vld [vmem:[#allocation2 + $0x8] sm:$0xff] }
0x1190   :  { %1462 = vmatmul.msk.bf16.gmra.mxu3 %vm92_vm0, %v1511_v53 }
0x11fb   :  { %v916_v54 = vpop.permute.xlu0 %915 }
0x11fc   :  { %v918_v55 = vmul.f32 %v916_v54, %v899_v37 }
0x11fe   :  { %v920_v56 = vpack.c.bf16 %v918_v55, %v918_v55 }
0x1200   :  { %922 = vrot.lane.b32.xlu0 %v920_v56, %s1714_s29 }
0x1213   :  { %v773_v58 = vpop.f32.mrf.mxu3 }
0x1214   :  { %v774_v59 = vadd.f32 %v1935_v28, %v773_v58 }
0x121b   :  { %v775_v31 = vpop.f32.mrf.mxu3 }
0x121c   :  { %v776_v32 = vadd.f32 %v1935_v28, %v775_v31 }
0x1272   :  { %v923_v57 = vpop.permute.xlu0 %922 }
0x1273   :  { %1476 = vmatmul.msk.bf16.vlgmr.msrb.gmra.mxu0 %vm92_vm0, %v923_v57 }
0x12f0   :  { %v936_v60 = vpop.f32.mrf.mxu0 }
0x12f1   :  { %v940_v61 = vadd.f32 %v936_v60, %v774_v59 }
0x12f3   :  { %1599 = vtanh.f32 %v940_v61  ;;  %v1477_v0 = vmul.f32 -1.442695, %v940_v61 }
0x12f5   :  { %1601 = vpow2.f32 %v1477_v0 }
0x12f8   :  { %v938_v62 = vpop.f32.mrf.mxu0 }
0x12f9   :  { %v1600_v63 = vpop.eup %1599 }
0x12fa   :  { %963 = vrot.lane.b32.xlu1 %v1600_v63, %s1713_s28 }
0x12fb   :  { %v1602_v1 = vpop.eup %1601 }
0x12fc   :  { %v944_v2 = vadd.f32 1.0, %v1602_v1 }
0x12fe   :  { %1603 = vrcp.f32 %v944_v2  ;;  %v956_v13 = vand.u32 2147483648, %v944_v2  ;;  %vm950_vm9 = vweird.f32 %v944_v2  ;;  %v954_v14 = vand.u32 2147483647, %v944_v2 }
0x1300   :  { %v957_v5 = vor.u32 1.1754944e-38, %v956_v13  ;;  %vm955_vm12 = vcmp.eq.f32.partialorder %v954_v14, 8.507059e+37 }
0x1304   :  { %v1604_v4 = vpop.eup %1603 }
0x1305   :  { %v946_v10 = vmul.f32 %v1604_v4, %v944_v2  ;;  %vm951_vm8 = vweird.f32 %v1604_v4 }
0x1306   :  { %vm952_vm11 = vmor %vm950_vm9, %vm951_vm8 }
0x1307   :  { %v947_v35 = vsub.f32 1.0, %v946_v10 }
0x1309   :  { %v948_v11 = vmul.f32 %v1604_v4, %v947_v35 }
0x130b   :  { %v949_v12 = vadd.f32 %v1604_v4, %v948_v11 }
0x130d   :  { %v953_v3 = vsel %vm952_vm11, %v1604_v4, %v949_v12 }
0x130e   :  { %v958_v18 = vsel %vm955_vm12, %v957_v5, %v953_v3 }
0x130f   :  { %v961_v22 = vmul.f32 %v958_v18, %v912_v50 }
0x136c   :  { %v964_v17 = vpop.permute.xlu1 %963 }
0x136d   :  { %v966_v21 = vmul.f32 %v964_v17, %v958_v18 }
0x136f   :  { %968 = vrot.lane.b32.xlu2 %v966_v21, %s1713_s28 }
0x13c9   :  { %v969_v23 = vpop.permute.xlu2 %968 }
0x13ca   :  { %v971_v24 = vadd.f32 %v969_v23, %v961_v22 }
0x13cc   :  { %1605 = vtanh.f32 %v971_v24 }
0x13d2   :  { %v1606_v26 = vpop.eup %1605 }
0x13d3   :  { %974 = vrot.lane.b32.xlu0 %v1606_v26, %s1713_s28 }
0x1445   :  { %v975_v27 = vpop.permute.xlu0 %974 }
0x1446   :  { %v977_v6 = vmul.f32 %v975_v27, %v958_v18  ;;  %v1659_v18 = vld [vmem:[%s2070_s3] ss:$0 sm:$0xff]  ;;  %s1715_s3 = smov 96  }
0x1447   :  { %v132_v21 = vadd.f32 %v1659_v18, %v1973_v8 }
0x1448   :  { %v979_v29 = vpack.c.bf16 %v977_v6, %v977_v6 }
0x1449   :  { %v640_v23 = vadd.f32 %v1958_v25, %v132_v21 }
0x144a   :  { %981 = vrot.lane.b32.xlu1 %v979_v29, %s1714_s29 }
0x14bc   :  { %v982_v30 = vpop.permute.xlu1 %981 }
0x14bd   :  { %1478 = vmatmul.msk.bf16.vlgmr.msra.gmra.mxu1 %vm92_vm0, %v982_v30 }
0x153a   :  { %v995_v7 = vpop.f32.mrf.mxu1 }
0x153b   :  { %v999_v19 = vadd.f32 %v995_v7, %v776_v32  ;;  %v1436_v32 = vmul.f32 -1.442695, %v640_v23 }
0x153d   :  { %1607 = vtanh.f32 %v999_v19  ;;  %v1479_v34 = vmul.f32 -1.442695, %v999_v19 }
0x153f   :  { %1609 = vpow2.f32 %v1479_v34 }
0x1542   :  { %v997_v20 = vpop.f32.mrf.mxu1 }
0x1543   :  { %v1608_v33 = vpop.eup %1607 }
0x1544   :  { %1022 = vrot.lane.b32.xlu2 %v1608_v33, %s1713_s28 }
0x1545   :  { %v1610_v36 = vpop.eup %1609 }
0x1546   :  { %v1003_v38 = vadd.f32 1.0, %v1610_v36 }
0x1548   :  { %1611 = vrcp.f32 %v1003_v38  ;;  %v1015_v45 = vand.u32 2147483648, %v1003_v38  ;;  %vm1009_vm14 = vweird.f32 %v1003_v38  ;;  %v1013_v37 = vand.u32 2147483647, %v1003_v38 }
0x154a   :  { %v1016_v47 = vor.u32 1.1754944e-38, %v1015_v45  ;;  %vm1014_vm1 = vcmp.eq.f32.partialorder %v1013_v37, 8.507059e+37 }
0x154c   :  { %479 = vrot.lane.b32.xlu2 %v1873_v41, %s1714_s29 }
0x154e   :  { %v1612_v39 = vpop.eup %1611 }
0x154f   :  { %v1005_v40 = vmul.f32 %v1612_v39, %v1003_v38  ;;  %vm1010_vm13 = vweird.f32 %v1612_v39 }
0x1550   :  { %vm1011_vm15 = vmor %vm1009_vm14, %vm1010_vm13 }
0x1551   :  { %v1006_v42 = vsub.f32 1.0, %v1005_v40 }
0x1553   :  { %v1007_v43 = vmul.f32 %v1612_v39, %v1006_v42 }
0x1555   :  { %v1008_v44 = vadd.f32 %v1612_v39, %v1007_v43 }
0x1557   :  { %v1012_v46 = vsel %vm1011_vm15, %v1612_v39, %v1008_v44 }
0x1558   :  { %v1017_v41 = vsel %vm1014_vm1, %v1016_v47, %v1012_v46 }
0x1559   :  { %v1020_v51 = vmul.f32 %v1017_v41, %v971_v24 }
0x159e   :  { %v1023_v48 = vpop.permute.xlu2 %1022 }
0x159f   :  { %v1025_v49 = vmul.f32 %v1023_v48, %v1017_v41 }
0x15a1   :  { %1027 = vrot.lane.b32.xlu0 %v1025_v49, %s1713_s28 }
0x15a6   :  { %v480_v50 = vpop.permute.xlu2 %479 }
0x15a7   :  { %483 = vst.msk [vmem:[#allocation2 + $0x10] sm:$0xf] %vm214_vm10, %v480_v50 }
0x15a9   :  { %546 = vrot.lane.b32.xlu0 %v1900_v15, %s1714_s29 }
0x1613   :  { %v1028_v52 = vpop.permute.xlu0 %1027 }
0x1614   :  { %v1030_v53 = vadd.f32 %v1028_v52, %v1020_v51 }
0x1616   :  { %1613 = vtanh.f32 %v1030_v53 }
0x161b   :  { %v547_v54 = vpop.permute.xlu0 %546 }
0x161c   :  { %v1614_v55 = vpop.eup %1613  ;;  %550 = vst.msk [vmem:[#allocation2 + $0x14] sm:$0xf] %vm214_vm10, %v547_v54 }
0x161d   :  { %1033 = vrot.lane.b32.xlu1 %v1614_v55, %s1713_s28 }
0x1623   :  { %v1512_v56 = vld [vmem:[#allocation2 + $0x10] sm:$0xff] }
0x1624   :  { %1463 = vmatmul.msk.bf16.gmra.mxu3 %vm92_vm0, %v1512_v56 }
0x168f   :  { %v1034_v57 = vpop.permute.xlu1 %1033 }
0x1690   :  { %v1036_v58 = vmul.f32 %v1034_v57, %v1017_v41 }
0x1692   :  { %v1038_v59 = vpack.c.bf16 %v1036_v58, %v1036_v58 }
0x1694   :  { %1040 = vrot.lane.b32.xlu1 %v1038_v59, %s1714_s29 }
0x16a7   :  { %v778_v15 = vpop.f32.mrf.mxu3 }
0x16a8   :  { %v779_v61 = vadd.f32 %v1935_v28, %v778_v15 }
0x16af   :  { %v780_v41 = vpop.f32.mrf.mxu3 }
0x16b0   :  { %v781_v49 = vadd.f32 %v1935_v28, %v780_v41 }
0x1706   :  { %v1041_v60 = vpop.permute.xlu1 %1040 }
0x1707   :  { %1480 = vmatmul.msk.bf16.vlgmr.msra.gmra.mxu2 %vm92_vm0, %v1041_v60 }
0x178a   :  { %v1054_v62 = vpop.f32.mrf.mxu2 }
0x178b   :  { %v1058_v63 = vadd.f32 %v1054_v62, %v779_v61 }
0x178d   :  { %1615 = vtanh.f32 %v1058_v63  ;;  %v1481_v2 = vmul.f32 -1.442695, %v1058_v63 }
0x178f   :  { %1617 = vpow2.f32 %v1481_v2 }
0x1792   :  { %v1056_v0 = vpop.f32.mrf.mxu2 }
0x1793   :  { %v1616_v1 = vpop.eup %1615 }
0x1794   :  { %1081 = vrot.lane.b32.xlu2 %v1616_v1, %s1713_s28 }
0x1795   :  { %v1618_v4 = vpop.eup %1617 }
0x1796   :  { %v1062_v10 = vadd.f32 1.0, %v1618_v4 }
0x1798   :  { %1619 = vrcp.f32 %v1062_v10  ;;  %v1074_v3 = vand.u32 2147483648, %v1062_v10  ;;  %vm1068_vm3 = vweird.f32 %v1062_v10  ;;  %v1072_v5 = vand.u32 2147483647, %v1062_v10 }
0x1799   :  { %1621 = vtanh.f32 %v640_v23 }
0x179a   :  { %v1075_v22 = vor.u32 1.1754944e-38, %v1074_v3  ;;  %vm1073_vm5 = vcmp.eq.f32.partialorder %v1072_v5, 8.507059e+37 }
0x179e   :  { %v1620_v35 = vpop.eup %1619 }
0x179f   :  { %v1064_v11 = vmul.f32 %v1620_v35, %v1062_v10  ;;  %vm1069_vm2 = vweird.f32 %v1620_v35  ;;  %v1622_v6 = vpop.eup %1621 }
0x17a0   :  { %vm1070_vm4 = vmor %vm1068_vm3, %vm1069_vm2 }
0x17a1   :  { %v1065_v12 = vsub.f32 1.0, %v1064_v11 }
0x17a3   :  { %v1066_v13 = vmul.f32 %v1620_v35, %v1065_v12 }
0x17a5   :  { %v1067_v14 = vadd.f32 %v1620_v35, %v1066_v13 }
0x17a7   :  { %v1071_v17 = vsel %vm1070_vm4, %v1620_v35, %v1067_v14 }
0x17a8   :  { %v1076_v26 = vsel %vm1073_vm5, %v1075_v22, %v1071_v17 }
0x17a9   :  { %v1079_v29 = vmul.f32 %v1076_v26, %v1030_v53 }
0x17ee   :  { %v1082_v24 = vpop.permute.xlu2 %1081 }
0x17ef   :  { %v1084_v27 = vmul.f32 %v1082_v24, %v1076_v26 }
0x17f1   :  { %1086 = vrot.lane.b32.xlu0 %v1084_v27, %s1713_s28 }
0x17f9   :  { %663 = vrot.lane.b32.xlu0 %v1622_v6, %s1713_s28 }
0x1863   :  { %v1087_v30 = vpop.permute.xlu0 %1086 }
0x1864   :  { %v2003_v31 = vadd.f32 %v1087_v30, %v1079_v29 }
0x1866   :  { %1623 = vtanh.f32 %v2003_v31 }
0x1867   :  { %1625 = vpow2.f32 %v1436_v32 }
0x186b   :  { %v664_v37 = vpop.permute.xlu0 %663 }
0x186c   :  { %v1624_v8 = vpop.eup %1623 }
0x186d   :  { %1092 = vrot.lane.b32.xlu1 %v1624_v8, %s1713_s28  ;;  %v1626_v25 = vpop.eup %1625 }
0x186e   :  { %v644_v7 = vadd.f32 1.0, %v1626_v25 }
0x1870   :  { %1627 = vrcp.f32 %v644_v7  ;;  %v656_v42 = vand.u32 2147483648, %v644_v7  ;;  %vm650_vm7 = vweird.f32 %v644_v7  ;;  %v654_v43 = vand.u32 2147483647, %v644_v7 }
0x1872   :  { %v657_v45 = vor.u32 1.1754944e-38, %v656_v42  ;;  %vm655_vm9 = vcmp.eq.f32.partialorder %v654_v43, 8.507059e+37 }
0x1876   :  { %v1628_v19 = vpop.eup %1627 }
0x1877   :  { %v646_v20 = vmul.f32 %v1628_v19, %v644_v7  ;;  %vm651_vm6 = vweird.f32 %v1628_v19 }
0x1878   :  { %vm652_vm8 = vmor %vm650_vm7, %vm651_vm6 }
0x1879   :  { %v647_v33 = vsub.f32 1.0, %v646_v20 }
0x187b   :  { %v648_v34 = vmul.f32 %v1628_v19, %v647_v33 }
0x187d   :  { %v649_v39 = vadd.f32 %v1628_v19, %v648_v34 }
0x187f   :  { %v653_v44 = vsel %vm652_vm8, %v1628_v19, %v649_v39 }
0x1880   :  { %v658_v46 = vsel %vm655_vm9, %v657_v45, %v653_v44  ;;  %vm1344_vm9 = vcmask 7168  }
0x1881   :  { %v666_v47 = vmul.f32 %v664_v37, %v658_v46  ;;  %v661_v53 = vmul.f32 %v658_v46, %v1942_v9 }
0x18df   :  { %v1093_v36 = vpop.permute.xlu1 %1092 }
0x18e0   :  { %v1095_v38 = vmul.f32 %v1093_v36, %v1076_v26 }
0x18e2   :  { %v1097_v40 = vpack.c.bf16 %v1095_v38, %v1095_v38 }
0x18e4   :  { %1099 = vrot.lane.b32.xlu2 %v1097_v40, %s1714_s29 }
0x18ec   :  { %668 = vrot.lane.b32.xlu2 %v666_v47, %s1713_s28 }
0x193e   :  { %v1100_v48 = vpop.permute.xlu2 %1099 }
0x193f   :  { %1482 = vmatmul.msk.bf16.vlgmr.msra.gmra.mxu0 %vm92_vm0, %v1100_v48 }
0x1946   :  { %v669_v52 = vpop.permute.xlu2 %668 }
0x1947   :  { %v2012_v54 = vadd.f32 %v669_v52, %v661_v53 }
0x19bc   :  { %v1113_v50 = vpop.f32.mrf.mxu0 }
0x19bd   :  { %v1117_v51 = vadd.f32 %v1113_v50, %v781_v49 }
0x19bf   :  { %1629 = vtanh.f32 %v1117_v51  ;;  %v1483_v58 = vmul.f32 -1.442695, %v1117_v51 }
0x19c0   :  { %1631 = vtanh.f32 %v2012_v54 }
0x19c1   :  { %1633 = vpow2.f32 %v1483_v58 }
0x19c4   :  { %v1115_v55 = vpop.f32.mrf.mxu0 }
0x19c5   :  { %v1630_v56 = vpop.eup %1629 }
0x19c6   :  { %1140 = vrot.lane.b32.xlu1 %v1630_v56, %s1713_s28  ;;  %v1632_v57 = vpop.eup %1631 }
0x19c7   :  { %v1634_v59 = vpop.eup %1633 }
0x19c8   :  { %v1121_v60 = vadd.f32 1.0, %v1634_v59 }
0x19ca   :  { %1635 = vrcp.f32 %v1121_v60  ;;  %v1133_v0 = vand.u32 2147483648, %v1121_v60  ;;  %vm1127_vm12 = vweird.f32 %v1121_v60  ;;  %v1131_v1 = vand.u32 2147483647, %v1121_v60 }
0x19cc   :  { %v1134_v4 = vor.u32 1.1754944e-38, %v1133_v0  ;;  %vm1132_vm14 = vcmp.eq.f32.partialorder %v1131_v1, 8.507059e+37 }
0x19ce   :  { %674 = vrot.lane.b32.xlu1 %v1632_v57, %s1713_s28 }
0x19d0   :  { %v1636_v15 = vpop.eup %1635 }
0x19d1   :  { %v1123_v61 = vmul.f32 %v1636_v15, %v1121_v60  ;;  %vm1128_vm11 = vweird.f32 %v1636_v15 }
0x19d2   :  { %vm1129_vm13 = vmor %vm1127_vm12, %vm1128_vm11 }
0x19d3   :  { %v1124_v62 = vsub.f32 1.0, %v1123_v61 }
0x19d5   :  { %v1125_v9 = vmul.f32 %v1636_v15, %v1124_v62 }
0x19d7   :  { %v1126_v63 = vadd.f32 %v1636_v15, %v1125_v9 }
0x19d9   :  { %v1130_v2 = vsel %vm1129_vm13, %v1636_v15, %v1126_v63 }
0x19da   :  { %v1135_v35 = vsel %vm1132_vm14, %v1134_v4, %v1130_v2 }
0x19db   :  { %v1138_v3 = vmul.f32 %v1135_v35, %v2003_v31 }
0x1a38   :  { %v1141_v10 = vpop.permute.xlu1 %1140 }
0x1a39   :  { %v1143_v11 = vmul.f32 %v1141_v10, %v1135_v35 }
0x1a3b   :  { %1145 = vrot.lane.b32.xlu0 %v1143_v11, %s1713_s28 }
0x1a40   :  { %v675_v12 = vpop.permute.xlu1 %674 }
0x1a41   :  { %v2018_v13 = vmul.f32 %v675_v12, %v658_v46 }
0x1a43   :  { %v678_v14 = vpack.c.bf16 %v2018_v13, %v2018_v13  ;;  %613 = vrot.lane.b32.xlu0 %v1947_v16, %s1714_s29 }
0x1a45   :  { %680 = vrot.lane.b32.xlu1 %v678_v14, %s1714_s29 }
0x1aad   :  { %v1146_v5 = vpop.permute.xlu0 %1145 }
0x1aae   :  { %v1148_v17 = vadd.f32 %v1146_v5, %v1138_v3 }
0x1ab0   :  { %1637 = vtanh.f32 %v1148_v17 }
0x1ab5   :  { %v614_v18 = vpop.permute.xlu0 %613 }
0x1ab6   :  { %v1638_v21 = vpop.eup %1637  ;;  %617 = vst.msk [vmem:[#allocation2 + $0x18] sm:$0xf] %vm214_vm10, %v614_v18 }
0x1ab7   :  { %1151 = vrot.lane.b32.xlu2 %v1638_v21, %s1713_s28  ;;  %v681_v22 = vpop.permute.xlu1 %680 }
0x1ab8   :  { %684 = vst.msk [vmem:[#allocation2 + $0x1c] sm:$0xf] %vm214_vm10, %v681_v22  ;;  %v1514_v22 = vld [vmem:[%s2074_s7] sm:$0xff] }
0x1abf   :  { %v1513_v23 = vld [vmem:[#allocation2 + $0x18] sm:$0xff] }
0x1ac0   :  { %1464 = vmatmul.msk.bf16.gmra.mxu3 %vm92_vm0, %v1513_v23 }
0x1b11   :  { %v1152_v16 = vpop.permute.xlu2 %1151 }
0x1b12   :  { %v1154_v24 = vmul.f32 %v1152_v16, %v1135_v35 }
0x1b14   :  { %v1156_v26 = vpack.c.bf16 %v1154_v24, %v1154_v24 }
0x1b16   :  { %1158 = vrot.lane.b32.xlu2 %v1156_v26, %s1714_s29 }
0x1b43   :  { %v783_v6 = vpop.f32.mrf.mxu3 }
0x1b44   :  { %v784_v29 = vadd.f32 %v1935_v28, %v783_v6  ;;  %v1526_v6 = vld [vmem:[#allocation4] ss:$0 sm:$0xff] }
0x1b4b   :  { %v785_v53 = vpop.f32.mrf.mxu3 }
0x1b4c   :  { %v786_v55 = vadd.f32 %v1935_v28, %v785_v53 }
0x1b70   :  { %v1159_v27 = vpop.permute.xlu2 %1158 }
0x1b71   :  { %1484 = vmatmul.msk.bf16.vlgmr.msrb.gmra.mxu1 %vm92_vm0, %v1159_v27 }
0x1bee   :  { %v1172_v30 = vpop.f32.mrf.mxu1 }
0x1bef   :  { %v1176_v31 = vadd.f32 %v1172_v30, %v784_v29 }
0x1bf1   :  { %1639 = vtanh.f32 %v1176_v31  ;;  %v1485_v25 = vmul.f32 -1.442695, %v1176_v31 }
0x1bf3   :  { %1641 = vpow2.f32 %v1485_v25 }
0x1bf6   :  { %v1174_v8 = vpop.f32.mrf.mxu1 }
0x1bf7   :  { %v1640_v32 = vpop.eup %1639 }
0x1bf8   :  { %1199 = vrot.lane.b32.xlu0 %v1640_v32, %s1713_s28 }
0x1bf9   :  { %v1642_v7 = vpop.eup %1641 }
0x1bfa   :  { %v1180_v19 = vadd.f32 1.0, %v1642_v7 }
0x1bfc   :  { %1643 = vrcp.f32 %v1180_v19  ;;  %v1192_v39 = vand.u32 2147483648, %v1180_v19  ;;  %vm1186_vm15 = vweird.f32 %v1180_v19  ;;  %v1190_v40 = vand.u32 2147483647, %v1180_v19 }
0x1bfe   :  { %v1193_v43 = vor.u32 1.1754944e-38, %v1192_v39  ;;  %vm1191_vm2 = vcmp.eq.f32.partialorder %v1190_v40, 8.507059e+37 }
0x1c02   :  { %v1644_v20 = vpop.eup %1643 }
0x1c03   :  { %v1182_v33 = vmul.f32 %v1644_v20, %v1180_v19  ;;  %vm1187_vm10 = vweird.f32 %v1644_v20 }
0x1c04   :  { %vm1188_vm1 = vmor %vm1186_vm15, %vm1187_vm10 }
0x1c05   :  { %v1183_v34 = vsub.f32 1.0, %v1182_v33 }
0x1c07   :  { %v1184_v36 = vmul.f32 %v1644_v20, %v1183_v34 }
0x1c09   :  { %v1185_v38 = vadd.f32 %v1644_v20, %v1184_v36 }
0x1c0b   :  { %v1189_v42 = vsel %vm1188_vm1, %v1644_v20, %v1185_v38 }
0x1c0c   :  { %v1194_v45 = vsel %vm1191_vm2, %v1193_v43, %v1189_v42 }
0x1c0d   :  { %v1197_v46 = vmul.f32 %v1194_v45, %v1148_v17 }
0x1c6a   :  { %v1200_v44 = vpop.permute.xlu0 %1199 }
0x1c6b   :  { %v1202_v37 = vmul.f32 %v1200_v44, %v1194_v45 }
0x1c6d   :  { %1204 = vrot.lane.b32.xlu1 %v1202_v37, %s1713_s28 }
0x1cdf   :  { %v1205_v47 = vpop.permute.xlu1 %1204 }
0x1ce0   :  { %v1207_v48 = vadd.f32 %v1205_v47, %v1197_v46 }
0x1ce2   :  { %1645 = vtanh.f32 %v1207_v48 }
0x1ce8   :  { %v1646_v41 = vpop.eup %1645 }
0x1ce9   :  { %1210 = vrot.lane.b32.xlu2 %v1646_v41, %s1713_s28 }
0x1d43   :  { %v1211_v49 = vpop.permute.xlu2 %1210 }
0x1d44   :  { %v1213_v50 = vmul.f32 %v1211_v49, %v1194_v45 }
0x1d46   :  { %v1215_v51 = vpack.c.bf16 %v1213_v50, %v1213_v50 }
0x1d48   :  { %1217 = vrot.lane.b32.xlu0 %v1215_v51, %s1714_s29 }
0x1dba   :  { %v1218_v52 = vpop.permute.xlu0 %1217 }
0x1dbb   :  { %1486 = vmatmul.msk.bf16.vlgmr.msrb.gmra.mxu2 %vm92_vm0, %v1218_v52 }
0x1e3e   :  { %v1231_v56 = vpop.f32.mrf.mxu2 }
0x1e3f   :  { %v1235_v57 = vadd.f32 %v1231_v56, %v786_v55 }
0x1e41   :  { %1647 = vtanh.f32 %v1235_v57  ;;  %v1487_v60 = vmul.f32 -1.442695, %v1235_v57 }
0x1e43   :  { %1649 = vpow2.f32 %v1487_v60 }
0x1e46   :  { %v1233_v58 = vpop.f32.mrf.mxu2 }
0x1e47   :  { %v1648_v59 = vpop.eup %1647 }
0x1e48   :  { %1258 = vrot.lane.b32.xlu1 %v1648_v59, %s1713_s28 }
0x1e49   :  { %v1650_v15 = vpop.eup %1649 }
0x1e4a   :  { %v1239_v61 = vadd.f32 1.0, %v1650_v15 }
0x1e4c   :  { %1651 = vrcp.f32 %v1239_v61  ;;  %v1251_v2 = vand.u32 2147483648, %v1239_v61  ;;  %vm1245_vm4 = vweird.f32 %v1239_v61  ;;  %v1249_v28 = vand.u32 2147483647, %v1239_v61 }
0x1e4e   :  { %v1252_v10 = vor.u32 1.1754944e-38, %v1251_v2  ;;  %vm1250_vm6 = vcmp.eq.f32.partialorder %v1249_v28, 8.507059e+37 }
0x1e52   :  { %v1652_v62 = vpop.eup %1651 }
0x1e53   :  { %v1241_v9 = vmul.f32 %v1652_v62, %v1239_v61  ;;  %vm1246_vm3 = vweird.f32 %v1652_v62 }
0x1e54   :  { %vm1247_vm5 = vmor %vm1245_vm4, %vm1246_vm3 }
0x1e55   :  { %v1242_v63 = vsub.f32 1.0, %v1241_v9 }
0x1e57   :  { %v1243_v0 = vmul.f32 %v1652_v62, %v1242_v63 }
0x1e59   :  { %v1244_v1 = vadd.f32 %v1652_v62, %v1243_v0 }
0x1e5b   :  { %v1248_v4 = vsel %vm1247_vm5, %v1652_v62, %v1244_v1 }
0x1e5c   :  { %v1253_v11 = vsel %vm1250_vm6, %v1252_v10, %v1248_v4 }
0x1e5d   :  { %v1256_v14 = vmul.f32 %v1253_v11, %v1207_v48 }
0x1eba   :  { %v1259_v35 = vpop.permute.xlu1 %1258 }
0x1ebb   :  { %v1261_v12 = vmul.f32 %v1259_v35, %v1253_v11 }
0x1ebd   :  { %1263 = vrot.lane.b32.xlu2 %v1261_v12, %s1713_s28 }
0x1ec5   :  { %686 = vrot.lane.b32.xlu2 %v2018_v13, %s1714_s29  ;;  %v1515_v13 = vld [vmem:[%s2074_s7 + $0x8] sm:$0xff] }
0x1ec6   :  { %1318 = vmatpush.bf16.msrb.mxu0 %v1515_v13 }
0x1eca   :  { %1319 = vmatpush.bf16.msrb.mxu0 %v1514_v22 }
0x1f17   :  { %v1264_v3 = vpop.permute.xlu2 %1263 }
0x1f18   :  { %v1266_v5 = vadd.f32 %v1264_v3, %v1256_v14 }
0x1f1a   :  { %1653 = vtanh.f32 %v1266_v5  ;;  %1280 = vrot.lane.b32.xlu2 %v1266_v5, %s1715_s3 }
0x1f1f   :  { %v687_v17 = vpop.permute.xlu2 %686 }
0x1f20   :  { %v1654_v18 = vpop.eup %1653  ;;  %689 = vst.msk [vmem:[#allocation5] sm:$0xff] %vm92_vm0, %v687_v17 }
0x1f21   :  { %1269 = vrot.lane.b32.xlu0 %v1654_v18, %s1713_s28 }
0x1f29   :  { %691 = vrot.lane.b32.xlu0 %v2012_v54, %s1715_s3 }
0x1f74   :  { %v1281_v21 = vpop.permute.xlu2 %1280 }
0x1f75   :  { %1284 = vst.msk [vmem:[#allocation7 + $0x8] sm:$0xff] %vm92_vm0, %v1281_v21 }
0x1f93   :  { %v1270_v23 = vpop.permute.xlu0 %1269 }
0x1f94   :  { %v1272_v16 = vmul.f32 %v1270_v23, %v1253_v11 }
0x1f96   :  { %v1285_v24 = vpack.c.bf16 %v1272_v16, %v1272_v16 }
0x1f98   :  { %1295 = vrot.lane.b32.xlu1 %v1285_v24, %s1714_s29 }
0x1f9b   :  { %v692_v26 = vpop.permute.xlu0 %691 }
0x1f9c   :  { %694 = vst.msk [vmem:[#allocation7] sm:$0xff] %vm92_vm0, %v692_v26 }
0x1f9d   :  { %1373 = dma.vmem_to_hbm [thread:$0]  %s1366_s15, 256, %s1368_s17, [#allocation8], %s1717_s12, %s1717_s12, %s1718_s13  }
0x1fa0   :  { %1274 = vrot.lane.b32.xlu1 %v1272_v16, %s1714_s29 }
0x200a   :  { %v1296_v54 = vpop.permute.xlu1 %1295 }
0x200b   :  { %1496 = vmatmul.msk.bf16.vlgmr.msrb.gmra.mxu0 %vm92_vm0, %v1296_v54 }
0x2012   :  { %v1275_v27 = vpop.permute.xlu1 %1274 }
0x2013   :  { %1278 = vst.msk [vmem:[#allocation5 + $0x8] sm:$0xff] %vm92_vm0, %v1275_v27 }
0x2014   :  { %1360 = dma.vmem_to_hbm [thread:$0]  %s1353_s2, 256, %s1355_s30, [#allocation6], %s1717_s12, %s1717_s12, %s1718_s13  }
0x2088   :  { %v1321_v29 = vpop.f32.mrf.mxu0 }
0x2089   :  { %v1322_v30 = vadd.f32 %v1526_v6, %v1321_v29 }
0x208b   :  { %v1497_v31 = vmul.f32 -1.442695, %v1322_v30 }
0x208d   :  { %1655 = vpow2.f32 %v1497_v31 }
0x2090   :  { %v1323_v8 = vpop.f32.mrf.mxu0 }
0x2093   :  { %v1656_v32 = vpop.eup %1655 }
0x2094   :  { %v1328_v25 = vadd.f32 1.0, %v1656_v32 }
0x2096   :  { %1657 = vrcp.f32 %v1328_v25  ;;  %v1340_v33 = vand.u32 2147483648, %v1328_v25  ;;  %v1338_v36 = vand.u32 2147483647, %v1328_v25  ;;  %vm1334_vm7 = vweird.f32 %v1328_v25 }
0x2098   :  { %v1341_v39 = vor.u32 1.1754944e-38, %v1340_v33  ;;  %vm1339_vm11 = vcmp.eq.f32.partialorder %v1338_v36, 8.507059e+37 }
0x209c   :  { %v1658_v7 = vpop.eup %1657 }
0x209d   :  { %v1330_v19 = vmul.f32 %v1658_v7, %v1328_v25  ;;  %vm1335_vm0 = vweird.f32 %v1658_v7 }
0x209e   :  { %vm1336_vm8 = vmor %vm1334_vm7, %vm1335_vm0 }
0x209f   :  { %v1331_v20 = vsub.f32 1.0, %v1330_v19 }
0x20a1   :  { %v1332_v34 = vmul.f32 %v1658_v7, %v1331_v20 }
0x20a3   :  { %v1333_v38 = vadd.f32 %v1658_v7, %v1332_v34 }
0x20a5   :  { %v1337_v40 = vsel %vm1336_vm8, %v1658_v7, %v1333_v38 }
0x20a6   :  { %v1342_v42 = vsel %vm1339_vm11, %v1341_v39, %v1337_v40 }
0x20a7   :  { %1345 = vst.msk [vmem:[%s2076_s9] sm:$0xff] %vm1344_vm9, %v1342_v42 }
0x20a8   :  { %1708 = dma.done.wait [#allocation6], 256  }
0x20a9   :  { %1709 = vsyncadd [#allocation6], 4294967040 }
0x20aa   :  { %1710 = dma.done.wait [#allocation8], 256  }
0x20ab   :  { %1711 = vsyncadd [#allocation8], 4294967040 }
0x20ac   :  { %1384 = vsyncpa [#allocation6], 1 }
0x20ad   :  { %1385 = vsyncpa [#allocation8], 1 }

</bundles_post_ra>
